<compile_context>
chip_gen: v7x
topology: tpu7x:2x2x1
jax: 0.10.0
libtpu: 0.0.40
codegen_flags: <defaults>
</compile_context>

<pallas_src>
import jax
import jax.numpy as jnp
from jax.experimental import pallas as pl
from jax.experimental.pallas import tpu as pltpu


# --------------------------------------------------------------------------------------
# Kernel A: streamed Bahdanau attention (online softmax) + projections + single GRU step
# --------------------------------------------------------------------------------------
def _make_decoder_kernel(N, TL, E, D, A, Ae, mm_dtype, fuse_gates):
    f32 = jnp.float32

    def kernel(lens_ref, embed_ref, fc_ref, h0_ref, encp_ref, aemb_ref,
               w_ad_ref, v_ref, w_fp_ref, b_fp_ref, w_cp_ref, b_cp_ref, *rest):
        n_gru = 4 if fuse_gates else 10
        gru_refs = rest[:n_gru]
        h_ref, score_ref = rest[n_gru], rest[n_gru + 1]
        dec_scr, m_scr, l_scr, ctx_scr = rest[n_gru + 2:]

        li = pl.program_id(0)
        n_tiles = pl.num_programs(0)

        @pl.when(li == 0)
        def _init():
            # dec_proj depends only on the query -> compute once, keep in VMEM scratch.
            dec_scr[...] = jnp.dot(h0_ref[...], w_ad_ref[...], preferred_element_type=f32)
            m_scr[...] = jnp.full_like(m_scr, -jnp.inf)
            l_scr[...] = jnp.zeros_like(l_scr)
            ctx_scr[...] = jnp.zeros_like(ctx_scr)

        # ---- attention over one L-tile (enc_proj already includes W_enc @ h_enc + b) ----
        attn_out = jnp.tanh(encp_ref[...] + dec_scr[...][:, None, :])          # (N, TL, A)
        # score = <attn_out, v>: A is tiny, VPU mul + small lane reduce.
        score = jnp.sum(attn_out * v_ref[...][None, :, :], axis=-1)            # (N, TL) f32
        pos = li * TL + jax.lax.broadcasted_iota(jnp.int32, (N, TL), 1)
        score = jnp.where(pos < lens_ref[...], score, -1e10)
        score_ref[...] = score          # raw masked scores; softmax of the returned weights
                                        # is a tiny (N, L) op done in the wrapper.

        # ---- online softmax accumulation of the context vector ----
        m_prev = m_scr[...]
        m_new = jnp.maximum(m_prev, jnp.max(score, axis=-1, keepdims=True))
        alpha = jnp.exp(m_prev - m_new)
        p = jnp.exp(score - m_new)                                             # (N, TL)
        l_scr[...] = alpha * l_scr[...] + jnp.sum(p, axis=-1, keepdims=True)
        aemb = aemb_ref[...]                                                   # (N, TL, Ae)
        ctx_tile = jnp.einsum('nql,nla->nqa', p[:, None, :].astype(aemb.dtype), aemb,
                              preferred_element_type=f32)[:, 0, :]             # (N, Ae)
        ctx_scr[...] = alpha * ctx_scr[...] + ctx_tile
        m_scr[...] = m_new

        # ---- last tile: projections + single GRU step (the module's concat forces T == 1) ----
        @pl.when(li == n_tiles - 1)
        def _finalize():
            ctx = ctx_scr[...] / l_scr[...]                                    # (N, Ae) f32
            p_fc = jnp.dot(fc_ref[...].astype(mm_dtype), w_fp_ref[...],
                           preferred_element_type=f32) + b_fp_ref[...]
            p_ctx = jnp.dot(ctx.astype(mm_dtype), w_cp_ref[...],
                            preferred_element_type=f32) + b_cp_ref[...]
            query = h0_ref[...]
            # cast each activation to the matmul dtype exactly once
            e_mm = embed_ref[...].astype(mm_dtype)
            c_mm = p_ctx.astype(mm_dtype)
            f_mm = p_fc.astype(mm_dtype)
            q_mm = query.astype(mm_dtype)

            def in_dot(x, w_ref, lo, hi):
                # static ref slice (sublane-aligned at multiples of E) -> zero-cost
                return jnp.dot(x, w_ref[lo:hi, :], preferred_element_type=f32)

            if fuse_gates:
                # D % 128 == 0: wide fused gate matmuls, lane slicing at D-aligned offsets.
                w_i_ref, w_h_ref, b_x_ref, b_h_ref = gru_refs
                gx = (in_dot(e_mm, w_i_ref, 0, E) + in_dot(c_mm, w_i_ref, E, 2 * E)
                      + in_dot(f_mm, w_i_ref, 2 * E, 3 * E) + b_x_ref[...])    # (N, 3D)
                gh = jnp.dot(q_mm, w_h_ref[...], preferred_element_type=f32) + b_h_ref[...]
                r = jax.nn.sigmoid(gx[:, 0:D] + gh[:, 0:D])
                z = jax.nn.sigmoid(gx[:, D:2 * D] + gh[:, D:2 * D])
                n = jnp.tanh(gx[:, 2 * D:3 * D] + r * gh[:, 2 * D:3 * D])
            else:
                # D < 128: per-gate split (pre-done host-side) keeps every gate lane-aligned at 0.
                (w_ir_ref, w_iz_ref, w_in_ref, w_hr_ref, w_hz_ref, w_hn_ref,
                 b_r_ref, b_z_ref, b_in_ref, b_hn_ref) = gru_refs

                def gate_x(w_ref):
                    return (in_dot(e_mm, w_ref, 0, E) + in_dot(c_mm, w_ref, E, 2 * E)
                            + in_dot(f_mm, w_ref, 2 * E, 3 * E))

                gh_r = jnp.dot(q_mm, w_hr_ref[...], preferred_element_type=f32)
                gh_z = jnp.dot(q_mm, w_hz_ref[...], preferred_element_type=f32)
                gh_n = jnp.dot(q_mm, w_hn_ref[...], preferred_element_type=f32)
                r = jax.nn.sigmoid(gate_x(w_ir_ref) + gh_r + b_r_ref[...])
                z = jax.nn.sigmoid(gate_x(w_iz_ref) + gh_z + b_z_ref[...])
                n = jnp.tanh(gate_x(w_in_ref) + b_in_ref[...] + r * (gh_n + b_hn_ref[...]))

            h_ref[...] = (1.0 - z) * n + z * query

    return kernel


# --------------------------------------------------------------------------------------
# Kernel B: classifier, tiled over the vocabulary (parallel grid -> v7x megacore)
# --------------------------------------------------------------------------------------
def _classifier_kernel(h_ref, w_ref, b_ref, logit_ref):
    logit_ref[...] = (jnp.dot(h_ref[...], w_ref[...],
                              preferred_element_type=jnp.float32) + b_ref[...])


def _classifier_logits(h, w_cls, b_cls, *, vocab_tile):
    N, D = h.shape
    V = w_cls.shape[1]
    if V > vocab_tile and V % vocab_tile == 0 and vocab_tile % 128 == 0:
        TV = vocab_tile
    else:
        TV = V
    grid = (V // TV,)
    # VMEM budget: double-buffered weight/bias/logit tiles + resident h, with headroom but kept
    # well under v7x's 64 MiB physical VMEM (v5e/v6e have 128 MiB).
    tile_bytes = 2 * TV * (D * w_cls.dtype.itemsize + 4 + N * 4) + N * D * h.dtype.itemsize
    vmem_limit = int(min(max(2 * tile_bytes, 32 * 1024 * 1024), 48 * 1024 * 1024))
    return pl.pallas_call(
        _classifier_kernel,
        out_shape=jax.ShapeDtypeStruct((N, V), jnp.float32),
        grid=grid,
        in_specs=[pl.BlockSpec((N, D), lambda j: (0, 0)),     # h, replicated across vocab tiles
                  pl.BlockSpec((D, TV), lambda j: (0, j)),    # weight tile (double-buffered DMA)
                  pl.BlockSpec((1, TV), lambda j: (0, j))],
        out_specs=pl.BlockSpec((N, TV), lambda j: (0, j)),
        compiler_params=pltpu.CompilerParams(
            dimension_semantics=("parallel",),                # shard vocab tiles across TCs (v7x)
            vmem_limit_bytes=vmem_limit),
    )(h, w_cls, b_cls)


# --------------------------------------------------------------------------------------
# Host-side weight preparation
# --------------------------------------------------------------------------------------
def _prepare_weights(params, mm_dtype, fuse_gates):
    f32 = jnp.float32
    D = params["w_hh"].shape[1]
    w_h2a = params["w_h2a"]                       # (A, D + Ae); concat order is (h_dec, h_enc)
    w_ih, w_hh = params["w_ih"], params["w_hh"]   # (3D, 3E), (3D, D); gate order (r, z, n)
    b_ih, b_hh = params["b_ih"], params["b_hh"]
    w = {
        # Attention projections stay f32: tiny, and the softmax weights are precision-sensitive.
        "w_att_dec": w_h2a[:, :D].T.astype(f32),              # (D, A)
        "v": params["v"].reshape(1, -1).astype(f32),          # (1, A)
        "w_fp": params["w_fp"].T.astype(mm_dtype),            # (Fe, E)
        "b_fp": params["b_fp"].reshape(1, -1).astype(f32),
        "w_cp": params["w_cp"].T.astype(mm_dtype),            # (Ae, E)
        "b_cp": params["b_cp"].reshape(1, -1).astype(f32),
        # TODO(synk): int8 (v5e/v6e) / fp8 (v7x) weight-only quant of w_cls (per-column scales,
        # dequant in-kernel) to halve the dominant HBM->VMEM bytes again.
        "w_cls": params["w_cls"].T.astype(mm_dtype),          # (D, V)
        "b_cls": params["b_cls"].reshape(1, -1).astype(f32),  # (1, V)
    }
    if fuse_gates:
        w["w_i"] = w_ih.T.astype(mm_dtype)                    # (3E, 3D), gates (r|z|n) on lanes
        w["w_h"] = w_hh.T.astype(mm_dtype)                    # (D, 3D)
        w["b_x"] = b_ih.reshape(1, -1).astype(f32)            # (1, 3D)
        w["b_h"] = b_hh.reshape(1, -1).astype(f32)            # (1, 3D)
    else:
        w.update(
            w_ir=w_ih[0:D].T.astype(mm_dtype),                # (3E, D) each
            w_iz=w_ih[D:2 * D].T.astype(mm_dtype),
            w_in=w_ih[2 * D:3 * D].T.astype(mm_dtype),
            w_hr=w_hh[0:D].T.astype(mm_dtype),                # (D, D) each
            w_hz=w_hh[D:2 * D].T.astype(mm_dtype),
            w_hn=w_hh[2 * D:3 * D].T.astype(mm_dtype),
            b_r=(b_ih[0:D] + b_hh[0:D]).reshape(1, D).astype(f32),
            b_z=(b_ih[D:2 * D] + b_hh[D:2 * D]).reshape(1, D).astype(f32),
            b_in=b_ih[2 * D:3 * D].reshape(1, D).astype(f32),
            b_hn=b_hh[2 * D:3 * D].reshape(1, D).astype(f32),
        )
    return w


def precompute_attn_proj(params, attn_emb):
    """Step-invariant Bahdanau encoder projection (compute ONCE per utterance, reuse every step)."""
    D = params["w_hh"].shape[1]
    w_enc = params["w_h2a"][:, D:]                            # (A, Ae)
    return (attn_emb.astype(jnp.float32) @ w_enc.T.astype(jnp.float32)
            + params["b_h2a"]).astype(jnp.float32)            # (N, L, A)


# --------------------------------------------------------------------------------------
# Forward wrapper
# --------------------------------------------------------------------------------------
def bah_attn_decoder_forward(params, word, fc_emb, attn_emb, attn_emb_len, state=None, *,
                             enc_proj=None, matmul_dtype=jnp.bfloat16,
                             attn_tile=128, vocab_tile=2048):
    """Fused Pallas forward.  matmul_dtype=bfloat16 (default, all TPU generations: the MXU is
    native bf16 everywhere; accumulation and elementwise math stay f32)."""
    N, T = word.shape
    if T != 1:
        raise ValueError("BahAttnDecoder consumes one decoding step at a time (T must be 1).")
    D = params["w_hh"].shape[1]
    E = params["w_fp"].shape[0]
    L, Ae = attn_emb.shape[1], attn_emb.shape[2]
    A = params["w_h2a"].shape[0]

    # Embedding gather stays in XLA; everything else runs inside the kernels.
    embed = jnp.take(params["word_embedding"], word[:, 0], axis=0).astype(jnp.float32)  # (N, E)
    # TODO(synk): in_dropout(p=0.2) applies only in training mode; eval forward is identity.

    if state is None:
        state = jnp.zeros((1, N, D), jnp.float32)             # init_hidden: 1 layer, unidirectional
    h0 = jnp.transpose(state, (1, 0, 2)).reshape(N, D).astype(jnp.float32)
    lens = attn_emb_len.astype(jnp.int32).reshape(N, 1)

    if enc_proj is None:
        enc_proj = precompute_attn_proj(params, attn_emb)     # (N, L, A) f32

    fuse_gates = (D % 128 == 0)
    w = _prepare_weights(params, matmul_dtype, fuse_gates)

    # L-streaming tile (must divide L and be a multiple of 8; otherwise fall back to one tile).
    if L > attn_tile and L % attn_tile == 0 and attn_tile % 8 == 0:
        TL = attn_tile
    else:
        TL = L
    num_tiles = L // TL

    gru_keys = (("w_i", "w_h", "b_x", "b_h") if fuse_gates else
                ("w_ir", "w_iz", "w_in", "w_hr", "w_hz", "w_hn",
                 "b_r", "b_z", "b_in", "b_hn"))
    weight_list = [w["w_att_dec"], w["v"], w["w_fp"], w["b_fp"], w["w_cp"], w["b_cp"]] \
                  + [w[k] for k in gru_keys]

    def _rep_spec(arr):   # full-extent 2-D block, replicated across the L grid
        return pl.BlockSpec(arr.shape, lambda l: (0, 0))

    in_specs = ([_rep_spec(lens), _rep_spec(embed), _rep_spec(fc_emb), _rep_spec(h0),
                 pl.BlockSpec((N, TL, A), lambda l: (0, l, 0)),
                 pl.BlockSpec((N, TL, Ae), lambda l: (0, l, 0))]
                + [_rep_spec(x) for x in weight_list])

    kernel = _make_decoder_kernel(N, TL, E, D, A, Ae, matmul_dtype, fuse_gates)

    h_new, scores = pl.pallas_call(
        kernel,
        out_shape=(jax.ShapeDtypeStruct((N, D), jnp.float32),   # new hidden (== GRU output, T=1)
                   jax.ShapeDtypeStruct((N, L), jnp.float32)),  # masked attention scores
        grid=(num_tiles,),
        in_specs=in_specs,
        out_specs=(pl.BlockSpec((N, D), lambda l: (0, 0)),
                   pl.BlockSpec((N, TL), lambda l: (0, l))),
        scratch_shapes=[pltpu.VMEM((N, A), jnp.float32),    # dec_proj
                        pltpu.VMEM((N, 1), jnp.float32),    # running max
                        pltpu.VMEM((N, 1), jnp.float32),    # running denom
                        pltpu.VMEM((N, Ae), jnp.float32)],  # running (unnormalised) ctx
        compiler_params=pltpu.CompilerParams(
            dimension_semantics=("arbitrary",)),            # online-softmax carry across L tiles
    )(lens, embed, fc_emb, h0, enc_proj, attn_emb, *weight_list)

    # Tiny (N, L) normalisation of the returned weights; ctx already used in-kernel online softmax.
    attn_weight = jax.nn.softmax(scores, axis=-1)

    h_cls = h_new.astype(matmul_dtype)                       # cast once, reused by every vocab tile
    logit = _classifier_logits(h_cls, w["w_cls"], w["b_cls"], vocab_tile=vocab_tile)

    return {
        "state": h_new[None, :, :],      # (1, N, D) -- PyTorch GRU state layout
        "embed": h_new[:, None, :],      # (N, 1, D) -- RNN output (module returns it as 'embed')
        "logit": logit[:, None, :],      # (N, 1, V)
        "attn_weight": attn_weight,      # (N, L)
    }


# --------------------------------------------------------------------------------------
# Pure-JAX reference + parameter construction + self-test
# --------------------------------------------------------------------------------------
def _reference_forward(params, word, fc_emb, attn_emb, attn_emb_len, state=None):
    N, T = word.shape
    assert T == 1
    D = params["w_hh"].shape[1]
    L = attn_emb.shape[1]
    embed = params["word_embedding"][word]                               # (N, 1, E)
    if state is None:
        state = jnp.zeros((1, N, D), jnp.float32)
    query = jnp.transpose(state, (1, 0, 2)).reshape(N, -1)               # (N, D)
    h_enc = attn_emb
    attn_in = jnp.concatenate(
        [jnp.repeat(query[:, None, :], L, axis=1), h_enc], axis=-1)
    attn_out = jnp.tanh(attn_in @ params["w_h2a"].T + params["b_h2a"])
    score = attn_out @ params["v"]
    mask = jnp.arange(L)[None, :] < attn_emb_len[:, None]
    score = jnp.where(mask, score, -1e10)
    weights = jax.nn.softmax(score, axis=-1)
    ctx = jnp.einsum("nl,nla->na", weights, h_enc)
    p_fc = fc_emb @ params["w_fp"].T + params["b_fp"]
    p_ctx = ctx @ params["w_cp"].T + params["b_cp"]
    x = jnp.concatenate([embed[:, 0, :], p_ctx, p_fc], axis=-1)
    gx = x @ params["w_ih"].T + params["b_ih"]
    gh = query @ params["w_hh"].T + params["b_hh"]
    r = jax.nn.sigmoid(gx[:, :D] + gh[:, :D])
    z = jax.nn.sigmoid(gx[:, D:2 * D] + gh[:, D:2 * D])
    n = jnp.tanh(gx[:, 2 * D:] + r * gh[:, 2 * D:])
    h = (1.0 - z) * n + z * query
    out = h[:, None, :]
    logit = out @ params["w_cls"].T + params["b_cls"]
    return {"state": h[None], "embed": out, "logit": logit, "attn_weight": weights}


def _xavier(key, shape):
    fan_out, fan_in = shape
    bound = (6.0 / (fan_in + fan_out)) ** 0.5
    return jax.random.uniform(key, shape, jnp.float32, -bound, bound)


def make_params(key, *, vocab_size, emb_dim, fc_emb_dim, attn_emb_dim, d_model, attn_size):
    ks = jax.random.split(key, 13)
    D, E, A = d_model, emb_dim, attn_size
    return {
        "word_embedding": 0.1 * jax.random.normal(ks[0], (vocab_size, E), jnp.float32),
        "w_h2a": _xavier(ks[1], (A, D + attn_emb_dim)),       # Linear(attn_emb_dim + D, A)
        "b_h2a": jnp.zeros((A,), jnp.float32),
        "v": jax.random.normal(ks[2], (A,), jnp.float32),
        "w_fp": _xavier(ks[3], (E, fc_emb_dim)),
        "b_fp": 0.01 * jax.random.normal(ks[4], (E,), jnp.float32),
        "w_cp": _xavier(ks[5], (E, attn_emb_dim)),
        "b_cp": 0.01 * jax.random.normal(ks[6], (E,), jnp.float32),
        "w_ih": _xavier(ks[7], (3 * D, 3 * E)),               # GRU input weights, gates (r, z, n)
        "b_ih": 0.01 * jax.random.normal(ks[8], (3 * D,), jnp.float32),
        "w_hh": _xavier(ks[9], (3 * D, D)),
        "b_hh": 0.01 * jax.random.normal(ks[10], (3 * D,), jnp.float32),
        "w_cls": _xavier(ks[11], (vocab_size, D)),
        "b_cls": jnp.zeros((vocab_size,), jnp.float32),
    }


if __name__ == "__main__":
    def run_case(key, *, N, L, emb_dim, d_model, attn_size, attn_emb_dim, fc_emb_dim,
                 vocab_size, attn_tile, vocab_tile, name):
        kp, kw, kf, ka = jax.random.split(key, 4)
        params = make_params(kp, vocab_size=vocab_size, emb_dim=emb_dim,
                             fc_emb_dim=fc_emb_dim, attn_emb_dim=attn_emb_dim,
                             d_model=d_model, attn_size=attn_size)
        word = jax.random.randint(kw, (N, 1), 0, vocab_size)
        fc_emb = jax.random.normal(kf, (N, fc_emb_dim), jnp.float32)
        attn_emb = jax.random.normal(ka, (N, L, attn_emb_dim), jnp.float32)
        attn_emb_len = jnp.array([L] + [max(1, L - 3)] * (N - 1), jnp.int32)

        ref = _reference_forward(params, word, fc_emb, attn_emb, attn_emb_len)
        for mm_dtype, tol in ((jnp.float32, 3e-2), (jnp.bfloat16, 1e-1)):
            out = bah_attn_decoder_forward(params, word, fc_emb, attn_emb, attn_emb_len,
                                           matmul_dtype=mm_dtype,
                                           attn_tile=attn_tile, vocab_tile=vocab_tile)
            jax.block_until_ready(out)
            for k in ("state", "embed", "logit", "attn_weight"):
                assert out[k].shape == ref[k].shape, (name, k, out[k].shape, ref[k].shape)
                err = float(jnp.max(jnp.abs(out[k] - ref[k])))
                assert err < tol, (name, k, str(mm_dtype), err)

    key0 = jax.random.PRNGKey(0)
    k_small, k_tiled = jax.random.split(key0, 2)

    # Small case: single attention tile, single vocab tile, per-gate GRU path (D < 128).
    run_case(k_small, N=2, L=8, emb_dim=32, d_model=32, attn_size=32,
             attn_emb_dim=40, fc_emb_dim=48, vocab_size=64,
             attn_tile=128, vocab_tile=2048, name="small")

    # Tiled case: exercises the production paths — fused GRU gates (D % 128 == 0), attention
    # streamed over 3 L-tiles, classifier tiled over 2 vocab tiles on a "parallel" grid.
    run_case(k_tiled, N=2, L=24, emb_dim=32, d_model=128, attn_size=64,
             attn_emb_dim=40, fc_emb_dim=48, vocab_size=256,
             attn_tile=8, vocab_tile=128, name="tiled")

    print("KERNEL_OK")
</pallas_src>

<mosaic_0001>
module attributes {stable_mosaic.version = 11 : i64} {
  func.func @kernel(%arg0: i32, %arg1: memref<2x1xi32, #tpu.memory_space<vmem>>, %arg2: memref<2x32xf32, #tpu.memory_space<vmem>>, %arg3: memref<2x48xf32, #tpu.memory_space<vmem>>, %arg4: memref<2x32xf32, #tpu.memory_space<vmem>>, %arg5: memref<2x8x32xf32, #tpu.memory_space<vmem>>, %arg6: memref<2x8x40xf32, #tpu.memory_space<vmem>>, %arg7: memref<32x32xf32, #tpu.memory_space<vmem>>, %arg8: memref<1x32xf32, #tpu.memory_space<vmem>>, %arg9: memref<48x32xf32, #tpu.memory_space<vmem>>, %arg10: memref<1x32xf32, #tpu.memory_space<vmem>>, %arg11: memref<40x32xf32, #tpu.memory_space<vmem>>, %arg12: memref<1x32xf32, #tpu.memory_space<vmem>>, %arg13: memref<96x32xf32, #tpu.memory_space<vmem>>, %arg14: memref<96x32xf32, #tpu.memory_space<vmem>>, %arg15: memref<96x32xf32, #tpu.memory_space<vmem>>, %arg16: memref<32x32xf32, #tpu.memory_space<vmem>>, %arg17: memref<32x32xf32, #tpu.memory_space<vmem>>, %arg18: memref<32x32xf32, #tpu.memory_space<vmem>>, %arg19: memref<1x32xf32, #tpu.memory_space<vmem>>, %arg20: memref<1x32xf32, #tpu.memory_space<vmem>>, %arg21: memref<1x32xf32, #tpu.memory_space<vmem>>, %arg22: memref<1x32xf32, #tpu.memory_space<vmem>>, %arg23: memref<2x32xf32, #tpu.memory_space<vmem>>, %arg24: memref<2x8xf32, #tpu.memory_space<vmem>>, %arg25: memref<2x32xf32, #tpu.memory_space<vmem>>, %arg26: memref<2x1xf32, #tpu.memory_space<vmem>>, %arg27: memref<2x1xf32, #tpu.memory_space<vmem>>, %arg28: memref<2x40xf32, #tpu.memory_space<vmem>>) attributes {dimension_semantics = [#tpu.dimension_semantics<arbitrary>], iteration_bounds = array<i64: 1>, scalar_prefetch = 0 : i64, scratch_operands = 4 : i64, tpu.core_type = #tpu.core_type<tc>, window_params = [{pipeline_mode = #tpu.pipeline_mode<synchronous>, transform_indices = @transform_0, window_bounds = array<i64: 2, 1>}, {pipeline_mode = #tpu.pipeline_mode<synchronous>, transform_indices = @transform_1, window_bounds = array<i64: 2, 32>}, {pipeline_mode = #tpu.pipeline_mode<synchronous>, transform_indices = @transform_2, window_bounds = array<i64: 2, 48>}, {pipeline_mode = #tpu.pipeline_mode<synchronous>, transform_indices = @transform_3, window_bounds = array<i64: 2, 32>}, {transform_indices = @transform_4, window_bounds = array<i64: 2, 8, 32>}, {transform_indices = @transform_5, window_bounds = array<i64: 2, 8, 40>}, {pipeline_mode = #tpu.pipeline_mode<synchronous>, transform_indices = @transform_6, window_bounds = array<i64: 32, 32>}, {pipeline_mode = #tpu.pipeline_mode<synchronous>, transform_indices = @transform_7, window_bounds = array<i64: 1, 32>}, {pipeline_mode = #tpu.pipeline_mode<synchronous>, transform_indices = @transform_8, window_bounds = array<i64: 48, 32>}, {pipeline_mode = #tpu.pipeline_mode<synchronous>, transform_indices = @transform_9, window_bounds = array<i64: 1, 32>}, {pipeline_mode = #tpu.pipeline_mode<synchronous>, transform_indices = @transform_10, window_bounds = array<i64: 40, 32>}, {pipeline_mode = #tpu.pipeline_mode<synchronous>, transform_indices = @transform_11, window_bounds = array<i64: 1, 32>}, {pipeline_mode = #tpu.pipeline_mode<synchronous>, transform_indices = @transform_12, window_bounds = array<i64: 96, 32>}, {pipeline_mode = #tpu.pipeline_mode<synchronous>, transform_indices = @transform_13, window_bounds = array<i64: 96, 32>}, {pipeline_mode = #tpu.pipeline_mode<synchronous>, transform_indices = @transform_14, window_bounds = array<i64: 96, 32>}, {pipeline_mode = #tpu.pipeline_mode<synchronous>, transform_indices = @transform_15, window_bounds = array<i64: 32, 32>}, {pipeline_mode = #tpu.pipeline_mode<synchronous>, transform_indices = @transform_16, window_bounds = array<i64: 32, 32>}, {pipeline_mode = #tpu.pipeline_mode<synchronous>, transform_indices = @transform_17, window_bounds = array<i64: 32, 32>}, {pipeline_mode = #tpu.pipeline_mode<synchronous>, transform_indices = @transform_18, window_bounds = array<i64: 1, 32>}, {pipeline_mode = #tpu.pipeline_mode<synchronous>, transform_indices = @transform_19, window_bounds = array<i64: 1, 32>}, {pipeline_mode = #tpu.pipeline_mode<synchronous>, transform_indices = @transform_20, window_bounds = array<i64: 1, 32>}, {pipeline_mode = #tpu.pipeline_mode<synchronous>, transform_indices = @transform_21, window_bounds = array<i64: 1, 32>}, {pipeline_mode = #tpu.pipeline_mode<synchronous>, transform_indices = @transform_22, window_bounds = array<i64: 2, 32>}, {transform_indices = @transform_23, window_bounds = array<i64: 2, 8>}]} {
    %c0_i32 = arith.constant 0 : i32
    %0 = arith.cmpi eq, %arg0, %c0_i32 : i32
    %1 = arith.extui %0 : i1 to i32
    %c0_i32_0 = arith.constant 0 : i32
    %2 = arith.cmpi ne, %1, %c0_i32_0 : i32
    scf.if %2 {
      %c0_32 = arith.constant 0 : index
      %c0_33 = arith.constant 0 : index
      %52 = vector.load %arg4[%c0_32, %c0_33] : memref<2x32xf32, #tpu.memory_space<vmem>>, vector<2x32xf32>
      %c0_34 = arith.constant 0 : index
      %c0_35 = arith.constant 0 : index
      %53 = vector.load %arg7[%c0_34, %c0_35] : memref<32x32xf32, #tpu.memory_space<vmem>>, vector<32x32xf32>
      %cst_36 = arith.constant dense<0.000000e+00> : vector<2x32xf32>
      %54 = tpu.matmul %52, %53, %cst_36 {dimension_numbers = #tpu.dot_dimension_numbers<[1], [0], [0], [1], [0, 0, 1, 1], [], []>} : vector<2x32xf32>, vector<32x32xf32>, vector<2x32xf32> -> vector<2x32xf32>
      %c0_37 = arith.constant 0 : index
      %c0_38 = arith.constant 0 : index
      %55 = vector.load %arg25[%c0_37, %c0_38] : memref<2x32xf32, #tpu.memory_space<vmem>>, vector<2x32xf32>
      tpu.vector_store %arg25[%c0_37, %c0_38], %54 {strides = array<i32>} : memref<2x32xf32, #tpu.memory_space<vmem>>, vector<2x32xf32>,
      %cst_39 = arith.constant 0xFF800000 : f32
      %56 = vector.broadcast %cst_39 : f32 to vector<2x1xf32>
      %c0_40 = arith.constant 0 : index
      %c0_41 = arith.constant 0 : index
      %57 = vector.load %arg26[%c0_40, %c0_41] : memref<2x1xf32, #tpu.memory_space<vmem>>, vector<2x1xf32>
      tpu.vector_store %arg26[%c0_40, %c0_41], %56 {strides = array<i32>} : memref<2x1xf32, #tpu.memory_space<vmem>>, vector<2x1xf32>,
      %cst_42 = arith.constant 0.000000e+00 : f32
      %58 = vector.broadcast %cst_42 : f32 to vector<2x1xf32>
      %c0_43 = arith.constant 0 : index
      %c0_44 = arith.constant 0 : index
      %59 = vector.load %arg27[%c0_43, %c0_44] : memref<2x1xf32, #tpu.memory_space<vmem>>, vector<2x1xf32>
      tpu.vector_store %arg27[%c0_43, %c0_44], %58 {strides = array<i32>} : memref<2x1xf32, #tpu.memory_space<vmem>>, vector<2x1xf32>,
      %cst_45 = arith.constant 0.000000e+00 : f32
      %60 = vector.broadcast %cst_45 : f32 to vector<2x40xf32>
      %c0_46 = arith.constant 0 : index
      %c0_47 = arith.constant 0 : index
      %61 = vector.load %arg28[%c0_46, %c0_47] : memref<2x40xf32, #tpu.memory_space<vmem>>, vector<2x40xf32>
      tpu.vector_store %arg28[%c0_46, %c0_47], %60 {strides = array<i32>} : memref<2x40xf32, #tpu.memory_space<vmem>>, vector<2x40xf32>,
    } else {
    }
    %c0 = arith.constant 0 : index
    %c0_1 = arith.constant 0 : index
    %c0_2 = arith.constant 0 : index
    %3 = vector.load %arg5[%c0, %c0_1, %c0_2] : memref<2x8x32xf32, #tpu.memory_space<vmem>>, vector<2x8x32xf32>
    %c0_3 = arith.constant 0 : index
    %c0_4 = arith.constant 0 : index
    %4 = vector.load %arg25[%c0_3, %c0_4] : memref<2x32xf32, #tpu.memory_space<vmem>>, vector<2x32xf32>
    %5 = vector.shape_cast %4 : vector<2x32xf32> to vector<2x1x32xf32>
    %6 = vector.broadcast %5 : vector<2x1x32xf32> to vector<2x8x32xf32>
    %7 = arith.addf %3, %6 : vector<2x8x32xf32>
    %8 = math.tanh %7 : vector<2x8x32xf32>
    %c0_5 = arith.constant 0 : index
    %c0_6 = arith.constant 0 : index
    %9 = vector.load %arg8[%c0_5, %c0_6] : memref<1x32xf32, #tpu.memory_space<vmem>>, vector<1x32xf32>
    %10 = vector.shape_cast %9 : vector<1x32xf32> to vector<1x1x32xf32>
    %11 = vector.broadcast %10 : vector<1x1x32xf32> to vector<2x8x32xf32>
    %12 = arith.mulf %8, %11 : vector<2x8x32xf32>
    %cst = arith.constant dense<0.000000e+00> : vector<2x8xf32>
    %13 = vector.multi_reduction <add>, %12, %cst [2] : vector<2x8x32xf32> to vector<2x8xf32>
    %c8_i32 = arith.constant 8 : i32
    %14 = arith.muli %arg0, %c8_i32 : i32
    %15 = tpu.iota {dimensions = array<i32: 1>} : vector<2x8xi32>
    %16 = vector.broadcast %14 : i32 to vector<2x8xi32>
    %17 = arith.addi %16, %15 : vector<2x8xi32>
    %c0_7 = arith.constant 0 : index
    %c0_8 = arith.constant 0 : index
    %18 = vector.load %arg1[%c0_7, %c0_8] : memref<2x1xi32, #tpu.memory_space<vmem>>, vector<2x1xi32>
    %19 = vector.broadcast %18 : vector<2x1xi32> to vector<2x8xi32>
    %20 = arith.cmpi slt, %17, %19 : vector<2x8xi32>
    %cst_9 = arith.constant -1.000000e+10 : f32
    %21 = vector.broadcast %cst_9 : f32 to vector<2x8xf32>
    %22 = arith.select %20, %13, %21 : vector<2x8xi1>, vector<2x8xf32>
    %c0_10 = arith.constant 0 : index
    %c0_11 = arith.constant 0 : index
    %23 = vector.load %arg24[%c0_10, %c0_11] : memref<2x8xf32, #tpu.memory_space<vmem>>, vector<2x8xf32>
    tpu.vector_store %arg24[%c0_10, %c0_11], %22 {strides = array<i32>} : memref<2x8xf32, #tpu.memory_space<vmem>>, vector<2x8xf32>,
    %c0_12 = arith.constant 0 : index
    %c0_13 = arith.constant 0 : index
    %24 = vector.load %arg26[%c0_12, %c0_13] : memref<2x1xf32, #tpu.memory_space<vmem>>, vector<2x1xf32>
    %cst_14 = arith.constant dense<0xFF800000> : vector<2xf32>
    %25 = vector.multi_reduction <maximumf>, %22, %cst_14 [1] : vector<2x8xf32> to vector<2xf32>
    %26 = vector.shape_cast %25 : vector<2xf32> to vector<2x1xf32>
    %27 = arith.maximumf %24, %26 : vector<2x1xf32>
    %28 = arith.subf %24, %27 : vector<2x1xf32>
    %29 = math.exp %28 : vector<2x1xf32>
    %30 = vector.broadcast %27 : vector<2x1xf32> to vector<2x8xf32>
    %31 = arith.subf %22, %30 : vector<2x8xf32>
    %32 = math.exp %31 : vector<2x8xf32>
    %c0_15 = arith.constant 0 : index
    %c0_16 = arith.constant 0 : index
    %33 = vector.load %arg27[%c0_15, %c0_16] : memref<2x1xf32, #tpu.memory_space<vmem>>, vector<2x1xf32>
    %34 = arith.mulf %29, %33 : vector<2x1xf32>
    %cst_17 = arith.constant dense<0.000000e+00> : vector<2xf32>
    %35 = vector.multi_reduction <add>, %32, %cst_17 [1] : vector<2x8xf32> to vector<2xf32>
    %36 = vector.shape_cast %35 : vector<2xf32> to vector<2x1xf32>
    %37 = arith.addf %34, %36 : vector<2x1xf32>
    %c0_18 = arith.constant 0 : index
    %c0_19 = arith.constant 0 : index
    %38 = vector.load %arg27[%c0_18, %c0_19] : memref<2x1xf32, #tpu.memory_space<vmem>>, vector<2x1xf32>
    tpu.vector_store %arg27[%c0_18, %c0_19], %37 {strides = array<i32>} : memref<2x1xf32, #tpu.memory_space<vmem>>, vector<2x1xf32>,
    %c0_20 = arith.constant 0 : index
    %c0_21 = arith.constant 0 : index
    %c0_22 = arith.constant 0 : index
    %39 = vector.load %arg6[%c0_20, %c0_21, %c0_22] : memref<2x8x40xf32, #tpu.memory_space<vmem>>, vector<2x8x40xf32>
    %40 = vector.shape_cast %32 : vector<2x8xf32> to vector<2x1x8xf32>
    "tpu.trace_start"() <{level = 10 : i32, message = "nql,nla->nqa"}> : () -> ()
    %cst_23 = arith.constant dense<0.000000e+00> : vector<2x1x40xf32>
    %41 = tpu.matmul %40, %39, %cst_23 {dimension_numbers = #tpu.dot_dimension_numbers<[2], [1], [1], [2], [0, 0, 0, 1, 1, 2], [0], [0]>} : vector<2x1x8xf32>, vector<2x8x40xf32>, vector<2x1x40xf32> -> vector<2x1x40xf32>
    "tpu.trace_stop"() : () -> ()
    %42 = vector.shape_cast %41 : vector<2x1x40xf32> to vector<2x40xf32>
    %c0_24 = arith.constant 0 : index
    %c0_25 = arith.constant 0 : index
    %43 = vector.load %arg28[%c0_24, %c0_25] : memref<2x40xf32, #tpu.memory_space<vmem>>, vector<2x40xf32>
    %44 = vector.broadcast %29 : vector<2x1xf32> to vector<2x40xf32>
    %45 = arith.mulf %44, %43 : vector<2x40xf32>
    %46 = arith.addf %45, %42 : vector<2x40xf32>
    %c0_26 = arith.constant 0 : index
    %c0_27 = arith.constant 0 : index
    %47 = vector.load %arg28[%c0_26, %c0_27] : memref<2x40xf32, #tpu.memory_space<vmem>>, vector<2x40xf32>
    tpu.vector_store %arg28[%c0_26, %c0_27], %46 {strides = array<i32>} : memref<2x40xf32, #tpu.memory_space<vmem>>, vector<2x40xf32>,
    %c0_28 = arith.constant 0 : index
    %c0_29 = arith.constant 0 : index
    %48 = vector.load %arg26[%c0_28, %c0_29] : memref<2x1xf32, #tpu.memory_space<vmem>>, vector<2x1xf32>
    tpu.vector_store %arg26[%c0_28, %c0_29], %27 {strides = array<i32>} : memref<2x1xf32, #tpu.memory_space<vmem>>, vector<2x1xf32>,
    %c0_i32_30 = arith.constant 0 : i32
    %49 = arith.cmpi eq, %arg0, %c0_i32_30 : i32
    %50 = arith.extui %49 : i1 to i32
    %c0_i32_31 = arith.constant 0 : i32
    %51 = arith.cmpi ne, %50, %c0_i32_31 : i32
    scf.if %51 {
      %c0_32 = arith.constant 0 : index
      %c0_33 = arith.constant 0 : index
      %52 = vector.load %arg28[%c0_32, %c0_33] : memref<2x40xf32, #tpu.memory_space<vmem>>, vector<2x40xf32>
      %c0_34 = arith.constant 0 : index
      %c0_35 = arith.constant 0 : index
      %53 = vector.load %arg27[%c0_34, %c0_35] : memref<2x1xf32, #tpu.memory_space<vmem>>, vector<2x1xf32>
      %54 = vector.broadcast %53 : vector<2x1xf32> to vector<2x40xf32>
      %55 = arith.divf %52, %54 : vector<2x40xf32>
      %c0_36 = arith.constant 0 : index
      %c0_37 = arith.constant 0 : index
      %56 = vector.load %arg3[%c0_36, %c0_37] : memref<2x48xf32, #tpu.memory_space<vmem>>, vector<2x48xf32>
      %c0_38 = arith.constant 0 : index
      %c0_39 = arith.constant 0 : index
      %57 = vector.load %arg9[%c0_38, %c0_39] : memref<48x32xf32, #tpu.memory_space<vmem>>, vector<48x32xf32>
      %cst_40 = arith.constant dense<0.000000e+00> : vector<2x32xf32>
      %58 = tpu.matmul %56, %57, %cst_40 {dimension_numbers = #tpu.dot_dimension_numbers<[1], [0], [0], [1], [0, 0, 1, 1], [], []>} : vector<2x48xf32>, vector<48x32xf32>, vector<2x32xf32> -> vector<2x32xf32>
      %c0_41 = arith.constant 0 : index
      %c0_42 = arith.constant 0 : index
      %59 = vector.load %arg10[%c0_41, %c0_42] : memref<1x32xf32, #tpu.memory_space<vmem>>, vector<1x32xf32>
      %60 = vector.broadcast %59 : vector<1x32xf32> to vector<2x32xf32>
      %61 = arith.addf %58, %60 : vector<2x32xf32>
      %c0_43 = arith.constant 0 : index
      %c0_44 = arith.constant 0 : index
      %62 = vector.load %arg11[%c0_43, %c0_44] : memref<40x32xf32, #tpu.memory_space<vmem>>, vector<40x32xf32>
      %cst_45 = arith.constant dense<0.000000e+00> : vector<2x32xf32>
      %63 = tpu.matmul %55, %62, %cst_45 {dimension_numbers = #tpu.dot_dimension_numbers<[1], [0], [0], [1], [0, 0, 1, 1], [], []>} : vector<2x40xf32>, vector<40x32xf32>, vector<2x32xf32> -> vector<2x32xf32>
      %c0_46 = arith.constant 0 : index
      %c0_47 = arith.constant 0 : index
      %64 = vector.load %arg12[%c0_46, %c0_47] : memref<1x32xf32, #tpu.memory_space<vmem>>, vector<1x32xf32>
      %65 = vector.broadcast %64 : vector<1x32xf32> to vector<2x32xf32>
      %66 = arith.addf %63, %65 : vector<2x32xf32>
      %c0_48 = arith.constant 0 : index
      %c0_49 = arith.constant 0 : index
      %67 = vector.load %arg4[%c0_48, %c0_49] : memref<2x32xf32, #tpu.memory_space<vmem>>, vector<2x32xf32>
      %c0_50 = arith.constant 0 : index
      %c0_51 = arith.constant 0 : index
      %68 = vector.load %arg2[%c0_50, %c0_51] : memref<2x32xf32, #tpu.memory_space<vmem>>, vector<2x32xf32>
      %c0_52 = arith.constant 0 : index
      %c0_53 = arith.constant 0 : index
      %69 = vector.load %arg16[%c0_52, %c0_53] : memref<32x32xf32, #tpu.memory_space<vmem>>, vector<32x32xf32>
      %cst_54 = arith.constant dense<0.000000e+00> : vector<2x32xf32>
      %70 = tpu.matmul %67, %69, %cst_54 {dimension_numbers = #tpu.dot_dimension_numbers<[1], [0], [0], [1], [0, 0, 1, 1], [], []>} : vector<2x32xf32>, vector<32x32xf32>, vector<2x32xf32> -> vector<2x32xf32>
      %c0_55 = arith.constant 0 : index
      %c0_56 = arith.constant 0 : index
      %71 = vector.load %arg17[%c0_55, %c0_56] : memref<32x32xf32, #tpu.memory_space<vmem>>, vector<32x32xf32>
      %cst_57 = arith.constant dense<0.000000e+00> : vector<2x32xf32>
      %72 = tpu.matmul %67, %71, %cst_57 {dimension_numbers = #tpu.dot_dimension_numbers<[1], [0], [0], [1], [0, 0, 1, 1], [], []>} : vector<2x32xf32>, vector<32x32xf32>, vector<2x32xf32> -> vector<2x32xf32>
      %c0_58 = arith.constant 0 : index
      %c0_59 = arith.constant 0 : index
      %73 = vector.load %arg18[%c0_58, %c0_59] : memref<32x32xf32, #tpu.memory_space<vmem>>, vector<32x32xf32>
      %cst_60 = arith.constant dense<0.000000e+00> : vector<2x32xf32>
      %74 = tpu.matmul %67, %73, %cst_60 {dimension_numbers = #tpu.dot_dimension_numbers<[1], [0], [0], [1], [0, 0, 1, 1], [], []>} : vector<2x32xf32>, vector<32x32xf32>, vector<2x32xf32> -> vector<2x32xf32>
      %c0_61 = arith.constant 0 : index
      %c0_62 = arith.constant 0 : index
      %75 = vector.load %arg13[%c0_61, %c0_62] : memref<96x32xf32, #tpu.memory_space<vmem>>, vector<32x32xf32>
      %cst_63 = arith.constant dense<0.000000e+00> : vector<2x32xf32>
      %76 = tpu.matmul %68, %75, %cst_63 {dimension_numbers = #tpu.dot_dimension_numbers<[1], [0], [0], [1], [0, 0, 1, 1], [], []>} : vector<2x32xf32>, vector<32x32xf32>, vector<2x32xf32> -> vector<2x32xf32>
      %c32 = arith.constant 32 : index
      %c0_64 = arith.constant 0 : index
      %77 = vector.load %arg13[%c32, %c0_64] : memref<96x32xf32, #tpu.memory_space<vmem>>, vector<32x32xf32>
      %cst_65 = arith.constant dense<0.000000e+00> : vector<2x32xf32>
      %78 = tpu.matmul %66, %77, %cst_65 {dimension_numbers = #tpu.dot_dimension_numbers<[1], [0], [0], [1], [0, 0, 1, 1], [], []>} : vector<2x32xf32>, vector<32x32xf32>, vector<2x32xf32> -> vector<2x32xf32>
      %79 = arith.addf %76, %78 : vector<2x32xf32>
      %c64 = arith.constant 64 : index
      %c0_66 = arith.constant 0 : index
      %80 = vector.load %arg13[%c64, %c0_66] : memref<96x32xf32, #tpu.memory_space<vmem>>, vector<32x32xf32>
      %cst_67 = arith.constant dense<0.000000e+00> : vector<2x32xf32>
      %81 = tpu.matmul %61, %80, %cst_67 {dimension_numbers = #tpu.dot_dimension_numbers<[1], [0], [0], [1], [0, 0, 1, 1], [], []>} : vector<2x32xf32>, vector<32x32xf32>, vector<2x32xf32> -> vector<2x32xf32>
      %82 = arith.addf %79, %81 : vector<2x32xf32>
      %83 = arith.addf %82, %70 : vector<2x32xf32>
      %c0_68 = arith.constant 0 : index
      %c0_69 = arith.constant 0 : index
      %84 = vector.load %arg19[%c0_68, %c0_69] : memref<1x32xf32, #tpu.memory_space<vmem>>, vector<1x32xf32>
      %85 = vector.broadcast %84 : vector<1x32xf32> to vector<2x32xf32>
      %86 = arith.addf %83, %85 : vector<2x32xf32>
      %87 = arith.negf %86 : vector<2x32xf32>
      %88 = math.exp %87 : vector<2x32xf32>
      %cst_70 = arith.constant 1.000000e+00 : f32
      %89 = vector.broadcast %cst_70 : f32 to vector<2x32xf32>
      %90 = arith.addf %89, %88 : vector<2x32xf32>
      %91 = arith.divf %89, %90 : vector<2x32xf32>
      %c0_71 = arith.constant 0 : index
      %c0_72 = arith.constant 0 : index
      %92 = vector.load %arg14[%c0_71, %c0_72] : memref<96x32xf32, #tpu.memory_space<vmem>>, vector<32x32xf32>
      %cst_73 = arith.constant dense<0.000000e+00> : vector<2x32xf32>
      %93 = tpu.matmul %68, %92, %cst_73 {dimension_numbers = #tpu.dot_dimension_numbers<[1], [0], [0], [1], [0, 0, 1, 1], [], []>} : vector<2x32xf32>, vector<32x32xf32>, vector<2x32xf32> -> vector<2x32xf32>
      %c32_74 = arith.constant 32 : index
      %c0_75 = arith.constant 0 : index
      %94 = vector.load %arg14[%c32_74, %c0_75] : memref<96x32xf32, #tpu.memory_space<vmem>>, vector<32x32xf32>
      %cst_76 = arith.constant dense<0.000000e+00> : vector<2x32xf32>
      %95 = tpu.matmul %66, %94, %cst_76 {dimension_numbers = #tpu.dot_dimension_numbers<[1], [0], [0], [1], [0, 0, 1, 1], [], []>} : vector<2x32xf32>, vector<32x32xf32>, vector<2x32xf32> -> vector<2x32xf32>
      %96 = arith.addf %93, %95 : vector<2x32xf32>
      %c64_77 = arith.constant 64 : index
      %c0_78 = arith.constant 0 : index
      %97 = vector.load %arg14[%c64_77, %c0_78] : memref<96x32xf32, #tpu.memory_space<vmem>>, vector<32x32xf32>
      %cst_79 = arith.constant dense<0.000000e+00> : vector<2x32xf32>
      %98 = tpu.matmul %61, %97, %cst_79 {dimension_numbers = #tpu.dot_dimension_numbers<[1], [0], [0], [1], [0, 0, 1, 1], [], []>} : vector<2x32xf32>, vector<32x32xf32>, vector<2x32xf32> -> vector<2x32xf32>
      %99 = arith.addf %96, %98 : vector<2x32xf32>
      %100 = arith.addf %99, %72 : vector<2x32xf32>
      %c0_80 = arith.constant 0 : index
      %c0_81 = arith.constant 0 : index
      %101 = vector.load %arg20[%c0_80, %c0_81] : memref<1x32xf32, #tpu.memory_space<vmem>>, vector<1x32xf32>
      %102 = vector.broadcast %101 : vector<1x32xf32> to vector<2x32xf32>
      %103 = arith.addf %100, %102 : vector<2x32xf32>
      %104 = arith.negf %103 : vector<2x32xf32>
      %105 = math.exp %104 : vector<2x32xf32>
      %cst_82 = arith.constant 1.000000e+00 : f32
      %106 = vector.broadcast %cst_82 : f32 to vector<2x32xf32>
      %107 = arith.addf %106, %105 : vector<2x32xf32>
      %108 = arith.divf %106, %107 : vector<2x32xf32>
      %c0_83 = arith.constant 0 : index
      %c0_84 = arith.constant 0 : index
      %109 = vector.load %arg15[%c0_83, %c0_84] : memref<96x32xf32, #tpu.memory_space<vmem>>, vector<32x32xf32>
      %cst_85 = arith.constant dense<0.000000e+00> : vector<2x32xf32>
      %110 = tpu.matmul %68, %109, %cst_85 {dimension_numbers = #tpu.dot_dimension_numbers<[1], [0], [0], [1], [0, 0, 1, 1], [], []>} : vector<2x32xf32>, vector<32x32xf32>, vector<2x32xf32> -> vector<2x32xf32>
      %c32_86 = arith.constant 32 : index
      %c0_87 = arith.constant 0 : index
      %111 = vector.load %arg15[%c32_86, %c0_87] : memref<96x32xf32, #tpu.memory_space<vmem>>, vector<32x32xf32>
      %cst_88 = arith.constant dense<0.000000e+00> : vector<2x32xf32>
      %112 = tpu.matmul %66, %111, %cst_88 {dimension_numbers = #tpu.dot_dimension_numbers<[1], [0], [0], [1], [0, 0, 1, 1], [], []>} : vector<2x32xf32>, vector<32x32xf32>, vector<2x32xf32> -> vector<2x32xf32>
      %113 = arith.addf %110, %112 : vector<2x32xf32>
      %c64_89 = arith.constant 64 : index
      %c0_90 = arith.constant 0 : index
      %114 = vector.load %arg15[%c64_89, %c0_90] : memref<96x32xf32, #tpu.memory_space<vmem>>, vector<32x32xf32>
      %cst_91 = arith.constant dense<0.000000e+00> : vector<2x32xf32>
      %115 = tpu.matmul %61, %114, %cst_91 {dimension_numbers = #tpu.dot_dimension_numbers<[1], [0], [0], [1], [0, 0, 1, 1], [], []>} : vector<2x32xf32>, vector<32x32xf32>, vector<2x32xf32> -> vector<2x32xf32>
      %116 = arith.addf %113, %115 : vector<2x32xf32>
      %c0_92 = arith.constant 0 : index
      %c0_93 = arith.constant 0 : index
      %117 = vector.load %arg21[%c0_92, %c0_93] : memref<1x32xf32, #tpu.memory_space<vmem>>, vector<1x32xf32>
      %118 = vector.broadcast %117 : vector<1x32xf32> to vector<2x32xf32>
      %119 = arith.addf %116, %118 : vector<2x32xf32>
      %c0_94 = arith.constant 0 : index
      %c0_95 = arith.constant 0 : index
      %120 = vector.load %arg22[%c0_94, %c0_95] : memref<1x32xf32, #tpu.memory_space<vmem>>, vector<1x32xf32>
      %121 = vector.broadcast %120 : vector<1x32xf32> to vector<2x32xf32>
      %122 = arith.addf %74, %121 : vector<2x32xf32>
      %123 = arith.mulf %91, %122 : vector<2x32xf32>
      %124 = arith.addf %119, %123 : vector<2x32xf32>
      %125 = math.tanh %124 : vector<2x32xf32>
      %cst_96 = arith.constant 1.000000e+00 : f32
      %126 = vector.broadcast %cst_96 : f32 to vector<2x32xf32>
      %127 = arith.subf %126, %108 : vector<2x32xf32>
      %128 = arith.mulf %127, %125 : vector<2x32xf32>
      %129 = arith.mulf %108, %67 : vector<2x32xf32>
      %130 = arith.addf %128, %129 : vector<2x32xf32>
      %c0_97 = arith.constant 0 : index
      %c0_98 = arith.constant 0 : index
      %131 = vector.load %arg23[%c0_97, %c0_98] : memref<2x32xf32, #tpu.memory_space<vmem>>, vector<2x32xf32>
      tpu.vector_store %arg23[%c0_97, %c0_98], %130 {strides = array<i32>} : memref<2x32xf32, #tpu.memory_space<vmem>>, vector<2x32xf32>,
    } else {
    }
    return
  }
  func.func @transform_0(%arg0: i32) -> (i32, i32) {
    %c0_i32 = arith.constant 0 : i32
    %c0_i32_0 = arith.constant 0 : i32
    %c0_i32_1 = arith.constant 0 : i32
    return %c0_i32, %c0_i32_0 : i32, i32
  }
  func.func @transform_1(%arg0: i32) -> (i32, i32) {
    %c0_i32 = arith.constant 0 : i32
    %c0_i32_0 = arith.constant 0 : i32
    %c0_i32_1 = arith.constant 0 : i32
    return %c0_i32, %c0_i32_0 : i32, i32
  }
  func.func @transform_2(%arg0: i32) -> (i32, i32) {
    %c0_i32 = arith.constant 0 : i32
    %c0_i32_0 = arith.constant 0 : i32
    %c0_i32_1 = arith.constant 0 : i32
    return %c0_i32, %c0_i32_0 : i32, i32
  }
  func.func @transform_3(%arg0: i32) -> (i32, i32) {
    %c0_i32 = arith.constant 0 : i32
    %c0_i32_0 = arith.constant 0 : i32
    %c0_i32_1 = arith.constant 0 : i32
    return %c0_i32, %c0_i32_0 : i32, i32
  }
  func.func @transform_4(%arg0: i32) -> (i32, i32, i32) {
    %c0_i32 = arith.constant 0 : i32
    %c0_i32_0 = arith.constant 0 : i32
    %c0_i32_1 = arith.constant 0 : i32
    return %c0_i32, %arg0, %c0_i32_0 : i32, i32, i32
  }
  func.func @transform_5(%arg0: i32) -> (i32, i32, i32) {
    %c0_i32 = arith.constant 0 : i32
    %c0_i32_0 = arith.constant 0 : i32
    %c0_i32_1 = arith.constant 0 : i32
    return %c0_i32, %arg0, %c0_i32_0 : i32, i32, i32
  }
  func.func @transform_6(%arg0: i32) -> (i32, i32) {
    %c0_i32 = arith.constant 0 : i32
    %c0_i32_0 = arith.constant 0 : i32
    %c0_i32_1 = arith.constant 0 : i32
    return %c0_i32, %c0_i32_0 : i32, i32
  }
  func.func @transform_7(%arg0: i32) -> (i32, i32) {
    %c0_i32 = arith.constant 0 : i32
    %c0_i32_0 = arith.constant 0 : i32
    %c0_i32_1 = arith.constant 0 : i32
    return %c0_i32, %c0_i32_0 : i32, i32
  }
  func.func @transform_8(%arg0: i32) -> (i32, i32) {
    %c0_i32 = arith.constant 0 : i32
    %c0_i32_0 = arith.constant 0 : i32
    %c0_i32_1 = arith.constant 0 : i32
    return %c0_i32, %c0_i32_0 : i32, i32
  }
  func.func @transform_9(%arg0: i32) -> (i32, i32) {
    %c0_i32 = arith.constant 0 : i32
    %c0_i32_0 = arith.constant 0 : i32
    %c0_i32_1 = arith.constant 0 : i32
    return %c0_i32, %c0_i32_0 : i32, i32
  }
  func.func @transform_10(%arg0: i32) -> (i32, i32) {
    %c0_i32 = arith.constant 0 : i32
    %c0_i32_0 = arith.constant 0 : i32
    %c0_i32_1 = arith.constant 0 : i32
    return %c0_i32, %c0_i32_0 : i32, i32
  }
  func.func @transform_11(%arg0: i32) -> (i32, i32) {
    %c0_i32 = arith.constant 0 : i32
    %c0_i32_0 = arith.constant 0 : i32
    %c0_i32_1 = arith.constant 0 : i32
    return %c0_i32, %c0_i32_0 : i32, i32
  }
  func.func @transform_12(%arg0: i32) -> (i32, i32) {
    %c0_i32 = arith.constant 0 : i32
    %c0_i32_0 = arith.constant 0 : i32
    %c0_i32_1 = arith.constant 0 : i32
    return %c0_i32, %c0_i32_0 : i32, i32
  }
  func.func @transform_13(%arg0: i32) -> (i32, i32) {
    %c0_i32 = arith.constant 0 : i32
    %c0_i32_0 = arith.constant 0 : i32
    %c0_i32_1 = arith.constant 0 : i32
    return %c0_i32, %c0_i32_0 : i32, i32
  }
  func.func @transform_14(%arg0: i32) -> (i32, i32) {
    %c0_i32 = arith.constant 0 : i32
    %c0_i32_0 = arith.constant 0 : i32
    %c0_i32_1 = arith.constant 0 : i32
    return %c0_i32, %c0_i32_0 : i32, i32
  }
  func.func @transform_15(%arg0: i32) -> (i32, i32) {
    %c0_i32 = arith.constant 0 : i32
    %c0_i32_0 = arith.constant 0 : i32
    %c0_i32_1 = arith.constant 0 : i32
    return %c0_i32, %c0_i32_0 : i32, i32
  }
  func.func @transform_16(%arg0: i32) -> (i32, i32) {
    %c0_i32 = arith.constant 0 : i32
    %c0_i32_0 = arith.constant 0 : i32
    %c0_i32_1 = arith.constant 0 : i32
    return %c0_i32, %c0_i32_0 : i32, i32
  }
  func.func @transform_17(%arg0: i32) -> (i32, i32) {
    %c0_i32 = arith.constant 0 : i32
    %c0_i32_0 = arith.constant 0 : i32
    %c0_i32_1 = arith.constant 0 : i32
    return %c0_i32, %c0_i32_0 : i32, i32
  }
  func.func @transform_18(%arg0: i32) -> (i32, i32) {
    %c0_i32 = arith.constant 0 : i32
    %c0_i32_0 = arith.constant 0 : i32
    %c0_i32_1 = arith.constant 0 : i32
    return %c0_i32, %c0_i32_0 : i32, i32
  }
  func.func @transform_19(%arg0: i32) -> (i32, i32) {
    %c0_i32 = arith.constant 0 : i32
    %c0_i32_0 = arith.constant 0 : i32
    %c0_i32_1 = arith.constant 0 : i32
    return %c0_i32, %c0_i32_0 : i32, i32
  }
  func.func @transform_20(%arg0: i32) -> (i32, i32) {
    %c0_i32 = arith.constant 0 : i32
    %c0_i32_0 = arith.constant 0 : i32
    %c0_i32_1 = arith.constant 0 : i32
    return %c0_i32, %c0_i32_0 : i32, i32
  }
  func.func @transform_21(%arg0: i32) -> (i32, i32) {
    %c0_i32 = arith.constant 0 : i32
    %c0_i32_0 = arith.constant 0 : i32
    %c0_i32_1 = arith.constant 0 : i32
    return %c0_i32, %c0_i32_0 : i32, i32
  }
  func.func @transform_22(%arg0: i32) -> (i32, i32) {
    %c0_i32 = arith.constant 0 : i32
    %c0_i32_0 = arith.constant 0 : i32
    %c0_i32_1 = arith.constant 0 : i32
    return %c0_i32, %c0_i32_0 : i32, i32
  }
  func.func @transform_23(%arg0: i32) -> (i32, i32) {
    %c0_i32 = arith.constant 0 : i32
    %c0_i32_0 = arith.constant 0 : i32
    return %c0_i32, %arg0 : i32, i32
  }
}

</mosaic_0001>

<bundles_post_ra>
// kernel: tpu_custom_call.1
= control target key start
LH: loop header
LB: loop body
LE: loop exit
PB: predicated region body
PF: predicated region fallthrough
CT: control target
= control target key end

     0   :  { %s2610_s0 = inlined_call_operand.vmem [shape: s32[2,1], index: 0, kind: input, shape index: {}]   ;;  %s2611_s1 = inlined_call_operand.vmem [shape: f32[2,32], index: 1, kind: input, shape index: {}]   ;;  %s2612_s2 = inlined_call_operand.vmem [shape: f32[2,48], index: 2, kind: input, shape index: {}]   ;;  %s2613_s3 = inlined_call_operand.vmem [shape: f32[2,32], index: 3, kind: input, shape index: {}]   ;;  %s2614_s4 = inlined_call_operand.vmem [shape: f32[2,8,32], index: 4, kind: input, shape index: {}]   ;;  %s2615_s5 = inlined_call_operand.vmem [shape: f32[2,8,40], index: 5, kind: input, shape index: {}]   ;;  %s2616_s6 = inlined_call_operand.vmem [shape: f32[32,32], index: 6, kind: input, shape index: {}]   ;;  %s2617_s7 = inlined_call_operand.vmem [shape: f32[1,32], index: 7, kind: input, shape index: {}]   ;;  %s2618_s8 = inlined_call_operand.vmem [shape: f32[48,32], index: 8, kind: input, shape index: {}]   ;;  %s2619_s9 = inlined_call_operand.vmem [shape: f32[1,32], index: 9, kind: input, shape index: {}]   ;;  %s2620_s10 = inlined_call_operand.vmem [shape: f32[40,32], index: 10, kind: input, shape index: {}]   ;;  %s2621_s11 = inlined_call_operand.vmem [shape: f32[1,32], index: 11, kind: input, shape index: {}]   ;;  %s2622_s12 = inlined_call_operand.vmem [shape: f32[96,32], index: 12, kind: input, shape index: {}]   ;;  %s2623_s13 = inlined_call_operand.vmem [shape: f32[96,32], index: 13, kind: input, shape index: {}]   ;;  %s2624_s14 = inlined_call_operand.vmem [shape: f32[96,32], index: 14, kind: input, shape index: {}]   ;;  %s2625_s15 = inlined_call_operand.vmem [shape: f32[32,32], index: 15, kind: input, shape index: {}]   ;;  %s2626_s16 = inlined_call_operand.vmem [shape: f32[32,32], index: 16, kind: input, shape index: {}]   ;;  %s2627_s17 = inlined_call_operand.vmem [shape: f32[32,32], index: 17, kind: input, shape index: {}]   ;;  %s2628_s18 = inlined_call_operand.vmem [shape: f32[1,32], index: 18, kind: input, shape index: {}]   ;;  %s2629_s19 = inlined_call_operand.vmem [shape: f32[1,32], index: 19, kind: input, shape index: {}]   ;;  %s2630_s20 = inlined_call_operand.vmem [shape: f32[1,32], index: 20, kind: input, shape index: {}]   ;;  %s2631_s21 = inlined_call_operand.vmem [shape: f32[1,32], index: 21, kind: input, shape index: {}]   ;;  %s2632_s22 = inlined_call_operand.hbm [shape: f32[2,32], index: 22, kind: output, shape index: {0}]   ;;  %s2633_s23 = inlined_call_operand.hbm [shape: f32[2,8], index: 23, kind: output, shape index: {1}]  }
   0x1   :  { %2638 = sst [smem:[#allocation12_spill]] %s2610_s0 }
   0x2   :  { %2639 = sst [smem:[#allocation13_spill]] %s2611_s1 }
   0x3   :  { %2640 = sst [smem:[#allocation14_spill]] %s2612_s2 }
   0x4   :  { %2641 = sst [smem:[#allocation15_spill]] %s2613_s3 }
   0x5   :  { %2642 = sst [smem:[#allocation16_spill]] %s2614_s4 }
   0x6   :  { %2643 = sst [smem:[#allocation17_spill]] %s2615_s5 }
   0x7   :  { %2644 = sst [smem:[#allocation18_spill]] %s2616_s6 }
   0x8   :  { %2645 = sst [smem:[#allocation19_spill]] %s2617_s7 }
   0x9   :  { %29 = vsyncpa [#allocation7], 0  ;;  %s2646_s24 = sld [smem:[#allocation18_spill]]  ;;  %v2091_v3 = vmov 0.0|0.0   ;;  %vm2092_vm0 = vmmov 0   ;;  %v2093_v6 = vmov 0.0  }
   0xa   :  { %1920 = vmatprep.subr.bf16.mxu0 %v2091_v3  ;;  %1747 = vmatprep.mubr.msk.f32.mxu0 %vm2092_vm0, %v2093_v6 }
   0xf   :  { %v80_v0 = vld [vmem:[%s2646_s24] sm:$0xff]  ;;  %v81_v1 = vld [vmem:[%s2646_s24 + $0x8] sm:$0xff]  ;;  %v82_v2 = vld [vmem:[%s2646_s24 + $0x10] sm:$0xff] }
  0x10   :  { %v1921_v4 = vpack.c.bf16 %v81_v1, %v80_v0  ;;  %v83_v5 = vld [vmem:[%s2646_s24 + $0x18] sm:$0xff] }
  0x11   :  { %30 = vsyncpa [#allocation9], 0  ;;  %1750 = vmatprep.subr.mxu1 %v2093_v6  ;;  %1752 = vmatprep.mubr.msk.f32.mxu1 %vm2092_vm0, %v2093_v6  ;;  %v1924_v7 = vpack.c.bf16 %v83_v5, %v82_v2  ;;  %s2647_s28 = sld [smem:[#allocation15_spill]]  ;;  %vm84_vm1 = vcmask 261120   ;;  %v180_v9 = vlaneseq  ;;  %s2648_s0 = sld [smem:[#allocation12_spill]]  ;;  %v2094_v13 = vmov 0  }
  0x12   :  { %1922 = vmatpush3.bf16.msra.mxu0 %v1921_v4  ;;  %2021 = vset.pattern.permute.xlu1 %v2094_v13  ;;  %v2095_v15 = vmov 1966171168   ;;  %vm158_vm2 = vcmask 254976   ;;  %s2649_s24 = sld [smem:[#allocation16_spill]]  ;;  %s2650_s2 = sld [smem:[#allocation19_spill]]  ;;  %vm160_vm3 = vcmask 1024  }
  0x13   :  { %1923 = vmatprep.subr.bf16.mxu0 %v2091_v3  ;;  %v181_v10 = vshrl.u32 %v180_v9, 7  ;;  %v223_v12 = vand.u32 127, %v180_v9  ;;  %2022 = vset.pattern.permute.xlu0 %v2094_v13  ;;  %v178_v16 = vunpack.c.l.s4 %v2095_v15  ;;  %v2096_v39 = vmov -inf   ;;  %162 = vst.msk [vmem:[#allocation4] sm:$0x3] %vm160_vm3, %v2093_v6  ;;  %s2651_s7 = sld [smem:[#allocation17_spill]] }
  0x14   :  { %161 = vst.msk [vmem:[#allocation3] sm:$0x3] %vm160_vm3, %v2096_v39  ;;  %vm241_vm4 = vcmask 1041409   ;;  %vm245_vm6 = vcmask 58368   ;;  %vm296_vm7 = vcmask 64512   ;;  %vm163_vm8 = vcmask 320512  }
  0x15   :  { %v235_v14 = vsub.s32 %v223_v12, %v181_v10  ;;  %v179_v19 = vunpack.c.0.s8 %v178_v16  ;;  %v193_v21 = vsub.s32 0, %v181_v10  ;;  %164 = vst.msk [vmem:[#allocation5] sm:$0x3] %vm163_vm8, %v2093_v6  ;;  %v558_v9 = vld [vmem:[%s2620_s10 + $0x8] sm:$0xff]  ;;  %v559_v13 = vld [vmem:[%s2620_s10 + $0x10] sm:$0xff]  ;;  %v560_v15 = vld [vmem:[%s2620_s10 + $0x18] sm:$0xff] }
  0x16   :  { %1925 = vmatpush3.bf16.msra.mxu0 %v1924_v7  ;;  %v1939_v16 = vpack.c.bf16 %v560_v15, %v559_v13  ;;  %s2652_s3 = sld [smem:[#allocation14_spill]]  ;;  %vm483_vm9 = vcmask 392192   ;;  %v1052_v39 = vld [vmem:[%s2623_s13 + $0x28] sm:$0xff]  ;;  %s2653_s4 = sld [smem:[#allocation13_spill]]  ;;  %vm569_vm10 = vcmask 326656   ;;  %v954_v15 = vld [vmem:[%s2622_s12 + $0x40] sm:$0xff] }
  0x17   :  { %v79_v8 = vld [vmem:[%s2647_s28] sm:$0x3]  ;;  %1935 = vmatprep.subr.bf16.mxu0 %v2091_v3  ;;  %v2249_v20 = vsub.s32 %v179_v19, %v181_v10 }
  0x18   :  { %v226_v11 = vld [vmem:[%s2648_s0] sm:$0x3]  ;;  %v166_v28 = vld [vmem:[%s2649_s24 + $0x8] sm:$0xff] }
  0x19   :  { %1748 = vmatmul.mubr.msk.f32.vlgmr.msra.gmra.mrb[0].mxu0 %vm84_vm1, %v79_v8  ;;  %228 = vperm.xlu1 %2021, %v226_v11   ;;  %v165_v25 = vld [vmem:[%s2649_s24] sm:$0xff]  ;;  %v272_v61 = vld [vmem:[%s2651_s7 + $0x8] sm:$0xff] }
  0x1a   :  { %1785 = vmatprep.mubr.msk.f32.mxu0 %vm2092_vm0, %v2093_v6  ;;  %v1632_v32 = vld [vmem:[%s2650_s2] ss:$0 sm:$0xff]  ;;  %v263_v1 = vld [vmem:[#allocation4] sm:$0x3] }
  0x1b   :  { %v247_v48 = vld [vmem:[#allocation3] sm:$0x3] }
  0x1c   :  { %v271_v52 = vld [vmem:[%s2651_s7] sm:$0xff] }
  0x1d   :  { %1751 = vmatpush3.msra.mxu1 %v271_v52  ;;  %v557_v8 = vld [vmem:[%s2620_s10] sm:$0xff] }
  0x1e   :  { %1755 = vmatprep.subr.mxu1 %v2093_v6  ;;  %v1936_v10 = vpack.c.bf16 %v558_v9, %v557_v8  ;;  %v470_v11 = vld [vmem:[%s2618_s8] sm:$0xff] }
  0x20   :  { %1937 = vmatpush3.bf16.msra.mxu0 %v1936_v10 }
  0x21   :  { %1938 = vmatprep.subr.bf16.mxu0 %v2091_v3 }
  0x24   :  { %1940 = vmatpush3.bf16.msra.mxu0 %v1939_v16  ;;  %v955_v16 = vld [vmem:[%s2622_s12 + $0x48] sm:$0xff] }
  0x25   :  { %1783 = vmatprep.subr.mxu0 %v2093_v6 }
  0x98   :  { %v229_v41 = vpop.permute.xlu1 %228 }
  0x99   :  { %vm230_vm5 = vcmp.lt.s32.totalorder %v223_v12, %v229_v41  ;;  %v471_v12 = vld [vmem:[%s2618_s8 + $0x8] sm:$0xff] }
  0xec   :  { %v154_v17 = vpop.f32.mrb[0].mxu0 }
  0xed   :  { %159 = vst.msk [vmem:[#allocation2] sm:$0x3] %vm158_vm2, %v154_v17  ;;  %v1749_v18 = vpop.f32.mrb[1].mxu0  ;;  %v472_v17 = vld [vmem:[%s2618_s8 + $0x10] sm:$0xff] }
  0xee   :  { %v473_v18 = vld [vmem:[%s2618_s8 + $0x18] sm:$0xff] }
  0xef   :  { %v1930_v19 = vpack.c.bf16 %v473_v18, %v472_v17  ;;  %v1195_v17 = vld [vmem:[%s2623_s13 + $0x40] sm:$0xff]  ;;  %v1196_v18 = vld [vmem:[%s2623_s13 + $0x48] sm:$0xff] }
  0xf4   :  { %v1631_v22 = vld.sshfl [vmem:[#allocation2] sm:$0x11 pattern:$0x75316420] }
  0xf5   :  { %v183_v23 = vrot.slane %v1631_v22, %v2249_v20  ;;  %v176_v24 = vcombine.high %v1631_v22, %v1631_v22  ;;  %v475_v22 = vld [vmem:[%s2618_s8 + $0x28] sm:$0xff] }
  0xf7   :  { %v194_v26 = vrot.slane %v183_v23, %v193_v21  ;;  %v190_v27 = vrot.slane %v176_v24, %v2249_v20  ;;  %v722_v24 = vld [vmem:[%s2626_s16] sm:$0xff] }
  0xf9   :  { %v201_v29 = vadd.f32 %v194_v26, %v165_v25  ;;  %v198_v30 = vrot.slane %v190_v27, %v193_v21  ;;  %v474_v21 = vld [vmem:[%s2618_s8 + $0x20] sm:$0xff]  ;;  %v723_v25 = vld [vmem:[%s2626_s16 + $0x8] sm:$0xff] }
  0xfa   :  { %v1933_v23 = vpack.c.bf16 %v475_v22, %v474_v21  ;;  %v469_v26 = vld [vmem:[%s2652_s3] sm:$0x3]  ;;  %v1948_v27 = vpack.c.bf16 %v723_v25, %v722_v24  ;;  %v1966_v21 = vpack.c.bf16 %v955_v16, %v954_v15  ;;  %v1984_v22 = vpack.c.bf16 %v1196_v18, %v1195_v17 }
  0xfb   :  { %2023 = vtanh.f32 %v201_v29  ;;  %v202_v31 = vadd.f32 %v198_v30, %v166_v28  ;;  %v724_v28 = vld [vmem:[%s2626_s16 + $0x10] sm:$0xff]  ;;  %v725_v29 = vld [vmem:[%s2626_s16 + $0x18] sm:$0xff] }
  0xfc   :  { %v1951_v30 = vpack.c.bf16 %v725_v29, %v724_v28  ;;  %v1198_v28 = vld [vmem:[%s2623_s13 + $0x58] sm:$0xff]  ;;  %v1635_v29 = vld [vmem:[%s2619_s9] ss:$0 sm:$0xff] }
  0xfd   :  { %2025 = vtanh.f32 %v202_v31  ;;  %v800_v31 = vld [vmem:[%s2622_s12] sm:$0xff] }
 0x105   :  { %v2024_v33 = vpop.eup %2023 }
 0x106   :  { %v212_v34 = vmul.f32 %v2024_v33, %v1632_v32  ;;  %v2356_v33 = vld [vmem:[%s2647_s28] sm:$0x3] }
 0x107   :  { %v2026_v35 = vpop.eup %2025 }
 0x108   :  { %v215_v36 = vsel %vm84_vm1, %v212_v34, 0.0  ;;  %v213_v37 = vmul.f32 %v2026_v35, %v1632_v32  ;;  %v801_v32 = vld [vmem:[%s2622_s12 + $0x8] sm:$0xff]  ;;  %v802_v35 = vld [vmem:[%s2622_s12 + $0x10] sm:$0xff] }
 0x109   :  { %216 = vadd.xlane.f32.xlu0 %v215_v36  ;;  %v1960_v34 = vpack.c.bf16 %v801_v32, %v800_v31  ;;  %v803_v36 = vld [vmem:[%s2622_s12 + $0x18] sm:$0xff]  ;;  %v1047_v32 = vld [vmem:[%s2623_s13] sm:$0xff] }
 0x10a   :  { %v218_v38 = vsel %vm84_vm1, %v213_v37, 0.0  ;;  %v1963_v37 = vpack.c.bf16 %v803_v36, %v802_v35  ;;  %v1285_v35 = vld [vmem:[%s2624_s14] sm:$0xff]  ;;  %v1286_v36 = vld [vmem:[%s2624_s14 + $0x8] sm:$0xff] }
 0x10d   :  { %219 = vadd.xlane.f32.xlu0 %v218_v38  ;;  %v1051_v38 = vld [vmem:[%s2623_s13 + $0x20] sm:$0xff] }
 0x10e   :  { %v1972_v41 = vpack.c.bf16 %v1052_v39, %v1051_v38 }
 0x196   :  { %v217_v40 = vpop.xlane.xlu0 %216 }
 0x197   :  { %v236_v43 = vrot.slane %v217_v40, %v235_v14  ;;  %v2379_v40 = vld [vmem:[%s2653_s4] sm:$0x3] }
 0x19a   :  { %v220_v42 = vpop.xlane.xlu0 %219 }
 0x19b   :  { %v240_v44 = vrot.slane %v220_v42, %v235_v14  ;;  %v1927_v14 = vpack.c.bf16 %v471_v12, %v470_v11  ;;  %v1053_v42 = vld [vmem:[%s2623_s13 + $0x30] sm:$0xff] }
 0x19d   :  { %v242_v45 = vsel %vm241_vm4, %v240_v44, %v236_v43  ;;  %v1054_v43 = vld [vmem:[%s2623_s13 + $0x38] sm:$0xff] }
 0x19e   :  { %v244_v46 = vsel %vm230_vm5, %v242_v45, -1e+10  ;;  %v1975_v44 = vpack.c.bf16 %v1054_v43, %v1053_v42  ;;  %v1050_v42 = vld [vmem:[%s2623_s13 + $0x18] sm:$0xff]  ;;  %v1996_v43 = vpack.c.bf16 %v1286_v36, %v1285_v35 }
 0x19f   :  { %v248_v47 = vsel %vm245_vm6, %v244_v46, -inf  ;;  %246 = vst.msk [vmem:[#allocation8] sm:$0x3] %vm245_vm6, %v244_v46 }
 0x1a0   :  { %249 = vmax.xlane.f32.xlu1 %v248_v47  ;;  %v441_v47 = vld [vmem:[#allocation5] sm:$0x3] }
 0x22d   :  { %v250_v49 = vpop.xlane.xlu1 %249 }
 0x22e   :  { %v251_v50 = vmax.f32 %v247_v48, %v250_v49 }
 0x230   :  { %v252_v51 = vsub.f32 %v247_v48, %v251_v50  ;;  %456 = vst.msk [vmem:[#allocation3] sm:$0x3] %vm160_vm3, %v251_v50  ;;  %257 = vperm.xlu0 %2022, %v251_v50  }
 0x232   :  { %v253_v62 = vmul.f32 1.442695, %v252_v51 }
 0x2af   :  { %v258_v53 = vpop.permute.xlu0 %257 }
 0x2b0   :  { %v260_v54 = vsub.f32 %v244_v46, %v258_v53 }
 0x2b2   :  { %v261_v55 = vmul.f32 1.442695, %v260_v54 }
 0x2b4   :  { %2027 = vpow2.f32 %v261_v55 }
 0x2b5   :  { %2029 = vpow2.f32 %v253_v62  ;;  %v647_v62 = vld [vmem:[%s2625_s15 + $0x10] sm:$0xff] }
 0x2be   :  { %v2028_v56 = vpop.eup %2027 }
 0x2bf   :  { %v265_v57 = vsel %vm245_vm6, %v2028_v56, 0.0  ;;  %v280_v58 = vrot.slane %v2028_v56, %v2249_v20  ;;  %v2030_v0 = vpop.eup %2029  ;;  %v645_v56 = vld [vmem:[%s2625_s15] sm:$0xff] }
 0x2c0   :  { %266 = vadd.xlane.f32.xlu1 %v265_v57  ;;  %v264_v2 = vmul.f32 %v2030_v0, %v263_v1  ;;  %v646_v57 = vld [vmem:[%s2625_s15 + $0x8] sm:$0xff]  ;;  %v804_v1 = vld [vmem:[%s2622_s12 + $0x20] sm:$0xff] }
 0x2c1   :  { %v281_v59 = vcombine.high %v280_v58, %v280_v58  ;;  %v288_v60 = vrot.slane %v280_v58, %v2249_v20 }
 0x2c3   :  { %1753 = vmatmul.mubr.msk.f32.vlgmr.msra.gmra.mrb[0].mxu1 %vm296_vm7, %v288_v60  ;;  %v295_v63 = vrot.slane %v281_v59, %v2249_v20  ;;  %v561_v20 = vld [vmem:[%s2620_s10 + $0x20] sm:$0xff]  ;;  %v1942_v60 = vpack.c.bf16 %v646_v57, %v645_v56  ;;  %v798_v57 = vld [vmem:[%s2627_s17 + $0x10] sm:$0xff] }
 0x2c4   :  { %1756 = vmatpush3.msra.mxu1 %v272_v61  ;;  %1757 = vmatprep.mubr.msk.f32.mxu1 %vm2092_vm0, %v2093_v6 }
 0x2c5   :  { %1926 = vmatprep.subr.bf16.mxu1 %v2091_v3  ;;  %1784 = vmatpush3.msra.mxu0 %v561_v20 }
 0x2c6   :  { %1941 = vmatprep.subr.bf16.mxu0 %v2091_v3 }
 0x2c7   :  { %1758 = vmatmul.mubr.msk.f32.vlgmr.msra.gmra.mrb[2].mxu1 %vm296_vm7, %v295_v63  ;;  %v648_v63 = vld [vmem:[%s2625_s15 + $0x18] sm:$0xff] }
 0x2c8   :  { %1772 = vmatprep.mubr.msk.f32.mxu1 %vm2092_vm0, %v2093_v6  ;;  %1928 = vmatpush3.bf16.msra.mxu1 %v1927_v14 }
 0x2c9   :  { %1929 = vmatprep.subr.bf16.mxu1 %v2091_v3 }
 0x2cc   :  { %1931 = vmatpush3.bf16.msra.mxu1 %v1930_v19  ;;  %v1637_v19 = vld [vmem:[%s2621_s11] ss:$0 sm:$0xff] }
 0x2cd   :  { %1932 = vmatprep.subr.bf16.mxu1 %v2091_v3 }
 0x2d0   :  { %1934 = vmatpush3.bf16.msra.mxu1 %v1933_v23  ;;  %v956_v23 = vld [vmem:[%s2622_s12 + $0x50] sm:$0xff] }
 0x2d1   :  { %444 = vperm.xlu1 %2021, %v2030_v0   ;;  %1947 = vmatprep.subr.bf16.mxu1 %v2091_v3  ;;  %v1945_v0 = vpack.c.bf16 %v648_v63, %v647_v62 }
 0x2d3   :  { %1773 = vmatmul.mubr.msk.f32.vlgmr.msra.gmra.mrb[4].mxu1 %vm483_vm9, %v469_v26  ;;  %v957_v26 = vld [vmem:[%s2622_s12 + $0x58] sm:$0xff] }
 0x2d4   :  { %1949 = vmatpush3.bf16.msra.mxu1 %v1948_v27  ;;  %1807 = vmatprep.mubr.msk.f32.mxu1 %vm2092_vm0, %v2093_v6  ;;  %v1197_v27 = vld [vmem:[%s2623_s13 + $0x50] sm:$0xff] }
 0x2d5   :  { %1950 = vmatprep.subr.bf16.mxu1 %v2091_v3  ;;  %v1987_v31 = vpack.c.bf16 %v1198_v28, %v1197_v27 }
 0x2d8   :  { %1952 = vmatpush3.bf16.msra.mxu1 %v1951_v30  ;;  %v1969_v30 = vpack.c.bf16 %v957_v26, %v956_v23 }
 0x2d9   :  { %1959 = vmatprep.subr.bf16.mxu1 %v2091_v3 }
 0x2db   :  { %1808 = vmatmul.mubr.msk.f32.vlgmr.msra.gmra.mrb[6].mxu1 %vm84_vm1, %v2356_v33 }
 0x2dc   :  { %1961 = vmatpush3.bf16.msra.mxu1 %v1960_v34  ;;  %1829 = vmatprep.mubr.msk.f32.mxu1 %vm2092_vm0, %v2093_v6  ;;  %v1048_v34 = vld [vmem:[%s2623_s13 + $0x8] sm:$0xff] }
 0x2dd   :  { %1962 = vmatprep.subr.bf16.mxu1 %v2091_v3  ;;  %v1978_v38 = vpack.c.bf16 %v1048_v34, %v1047_v32 }
 0x2e0   :  { %1964 = vmatpush3.bf16.msra.mxu1 %v1963_v37 }
 0x2e1   :  { %1971 = vmatprep.subr.bf16.mxu1 %v2091_v3 }
 0x2e3   :  { %1830 = vmatmul.mubr.msk.f32.vlgmr.msra.gmra.mrb[8].mxu1 %vm84_vm1, %v2379_v40 }
 0x2e4   :  { %1973 = vmatpush3.bf16.msra.mxu1 %v1972_v41  ;;  %1851 = vmatprep.mubr.msk.f32.mxu1 %vm2092_vm0, %v2093_v6  ;;  %v1049_v41 = vld [vmem:[%s2623_s13 + $0x10] sm:$0xff]  ;;  %s2097_s13 = smov [#allocation8]  }
 0x2e5   :  { %1974 = vmatprep.subr.bf16.mxu1 %v2091_v3  ;;  %s1618_s8 = sshll.u32 %s2097_s13, 4  ;;  %s1619_s8 = int_to_ptr.vmem [resolvable:$true] %s1618_s8 }
 0x2e6   :  { %p2048_p1 = scmp.lt.s32.totalorder %s1619_s8, %s1619_s8 }
 0x2e8   :  { %1976 = vmatpush3.bf16.msra.mxu1 %v1975_v44 }
 0x2e9   :  { %1983 = vmatprep.subr.bf16.mxu1 %v2091_v3 }
 0x34d   :  { %v267_v4 = vpop.xlane.xlu1 %266 }
 0x34e   :  { %v268_v5 = vadd.f32 %v267_v4, %v264_v2  ;;  %v805_v2 = vld [vmem:[%s2622_s12 + $0x28] sm:$0xff] }
 0x34f   :  { %v1954_v4 = vpack.c.bf16 %v805_v2, %v804_v1 }
 0x350   :  { %270 = vst.msk [vmem:[#allocation4] sm:$0x3] %vm160_vm3, %v268_v5  ;;  %v806_v5 = vld [vmem:[%s2622_s12 + $0x30] sm:$0xff] }
 0x351   :  { %v445_v48 = vpop.permute.xlu1 %444 }
 0x352   :  { %v447_v52 = vmul.f32 %v445_v48, %v441_v47  ;;  %v1981_v47 = vpack.c.bf16 %v1050_v42, %v1049_v41  ;;  %v1289_v48 = vld [vmem:[%s2624_s14 + $0x20] sm:$0xff] }
 0x357   :  { %v461_v7 = vld [vmem:[#allocation4] sm:$0x3] }
 0x358   :  { %464 = vperm.xlu0 %2022, %v461_v7   ;;  %v807_v7 = vld [vmem:[%s2622_s12 + $0x38] sm:$0xff] }
 0x359   :  { %v1957_v8 = vpack.c.bf16 %v807_v7, %v806_v5 }
 0x396   :  { %v365_v45 = vpop.f32.mrb[0].mxu1 }
 0x397   :  { %v1754_v46 = vpop.f32.mrb[1].mxu1 }
 0x398   :  { %v1288_v46 = vld [vmem:[%s2624_s14 + $0x18] sm:$0xff] }
 0x39a   :  { %v437_v49 = vpop.f32.mrb[2].mxu1 }
 0x39b   :  { %v450_v50 = vrot.slane %v437_v49, 7  ;;  %v1759_v51 = vpop.f32.mrb[3].mxu1  ;;  %v1290_v49 = vld [vmem:[%s2624_s14 + $0x28] sm:$0xff] }
 0x39c   :  { %v796_v51 = vld [vmem:[%s2627_s17] sm:$0xff] }
 0x39d   :  { %v451_v53 = vsel %vm241_vm4, %v450_v50, %v365_v45  ;;  %v1287_v45 = vld [vmem:[%s2624_s14 + $0x10] sm:$0xff] }
 0x39e   :  { %v453_v54 = vadd.f32 %v451_v53, %v447_v52  ;;  %v1999_v50 = vpack.c.bf16 %v1288_v46, %v1287_v45  ;;  %v797_v52 = vld [vmem:[%s2627_s17 + $0x8] sm:$0xff]  ;;  %v1990_v53 = vpack.c.bf16 %v1290_v49, %v1289_v48 }
 0x39f   :  { %v2008_v56 = vpack.c.bf16 %v797_v52, %v796_v51 }
 0x3a0   :  { %455 = vst.msk [vmem:[#allocation5] sm:$0x3] %vm163_vm8, %v453_v54  ;;  %v1291_v54 = vld [vmem:[%s2624_s14 + $0x30] sm:$0xff] }
 0x3a6   :  { %v553_v9 = vpop.f32.mrb[4].mxu1 }
 0x3a7   :  { %v460_v59 = vld [vmem:[#allocation5] sm:$0x3]  ;;  %v1774_v10 = vpop.f32.mrb[5].mxu1  ;;  %v554_v37 = vadd.f32 %v1635_v29, %v553_v9 }
 0x3ae   :  { %v2430_v11 = vpop.f32.mrb[6].mxu1 }
 0x3af   :  { %v1809_v12 = vpop.f32.mrb[7].mxu1 }
 0x3b6   :  { %v2432_v13 = vpop.f32.mrb[8].mxu1 }
 0x3b7   :  { %v1831_v14 = vpop.f32.mrb[9].mxu1 }
 0x3d7   :  { %v465_v55 = vpop.permute.xlu0 %464 }
 0x3d8   :  { %2031 = vrcp.f32 %v465_v55  ;;  %v1292_v55 = vld [vmem:[%s2624_s14 + $0x38] sm:$0xff] }
 0x3e2   :  { %v2032_v58 = vpop.eup %2031 }
 0x3e3   :  { %v468_v61 = vmul.f32 %v2032_v58, %v460_v59  ;;  %v799_v58 = vld [vmem:[%s2627_s17 + $0x18] sm:$0xff]  ;;  %v1993_v59 = vpack.c.bf16 %v1292_v55, %v1291_v54 }
 0x3e4   :  { %v2011_v62 = vpack.c.bf16 %v799_v58, %v798_v57 }
 0x3e5   :  { %1786 = vmatmul.mubr.msk.f32.vlgmr.msra.gmra.mrb[2].mxu0 %vm569_vm10, %v468_v61  ;;  %v1434_v61 = vld [vmem:[%s2624_s14 + $0x48] sm:$0xff] }
 0x3e6   :  { %1943 = vmatpush3.bf16.msra.mxu0 %v1942_v60  ;;  %1796 = vmatprep.mubr.msk.f32.mxu0 %vm2092_vm0, %v2093_v6  ;;  %v1433_v60 = vld [vmem:[%s2624_s14 + $0x40] sm:$0xff] }
 0x3e7   :  { %1944 = vmatprep.subr.bf16.mxu0 %v2091_v3  ;;  %v2002_v63 = vpack.c.bf16 %v1434_v61, %v1433_v60 }
 0x3ea   :  { %1946 = vmatpush3.bf16.msra.mxu0 %v1945_v0  ;;  %v1436_v0 = vld [vmem:[%s2624_s14 + $0x58] sm:$0xff] }
 0x3eb   :  { %1953 = vmatprep.subr.bf16.mxu0 %v2091_v3 }
 0x3ed   :  { %1797 = vmatmul.mubr.msk.f32.vlgmr.msra.gmra.mrb[4].mxu0 %vm84_vm1, %v2356_v33 }
 0x3ee   :  { %1955 = vmatpush3.bf16.msra.mxu0 %v1954_v4  ;;  %1818 = vmatprep.mubr.msk.f32.mxu0 %vm2092_vm0, %v2093_v6 }
 0x3ef   :  { %1956 = vmatprep.subr.bf16.mxu0 %v2091_v3 }
 0x3f2   :  { %1958 = vmatpush3.bf16.msra.mxu0 %v1957_v8 }
 0x3f3   :  { %1965 = vmatprep.subr.bf16.mxu0 %v2091_v3 }
 0x4b8   :  { %v639_v20 = vpop.f32.mrb[2].mxu0 }
 0x4b9   :  { %v2452_v24 = vadd.f32 %v1637_v19, %v639_v20  ;;  %v1787_v25 = vpop.f32.mrb[3].mxu0 }
 0x4bb   :  { %1819 = vmatmul.mubr.msk.f32.vlgmr.msra.gmra.mrb[6].mxu0 %vm84_vm1, %v2452_v24  ;;  %1852 = vmatmul.mubr.msk.f32.vlgmr.msra.gmra.mrb[10].mxu1 %vm84_vm1, %v2452_v24 }
 0x4bc   :  { %1967 = vmatpush3.bf16.msra.mxu0 %v1966_v21  ;;  %1985 = vmatpush3.bf16.msra.mxu1 %v1984_v22 }
 0x4bd   :  { %1968 = vmatprep.subr.bf16.mxu0 %v2091_v3  ;;  %1986 = vmatprep.subr.bf16.mxu1 %v2091_v3 }
 0x4be   :  { %1840 = vmatprep.mubr.msk.f32.mxu0 %vm2092_vm0, %v2093_v6  ;;  %1873 = vmatprep.mubr.msk.f32.mxu1 %vm2092_vm0, %v2093_v6 }
 0x4c0   :  { %1970 = vmatpush3.bf16.msra.mxu0 %v1969_v30  ;;  %1988 = vmatpush3.bf16.msra.mxu1 %v1987_v31  ;;  %v2488_v39 = vpop.f32.mrb[4].mxu0 }
 0x4c1   :  { %1977 = vmatprep.subr.bf16.mxu0 %v2091_v3  ;;  %1995 = vmatprep.subr.bf16.mxu1 %v2091_v3  ;;  %v1798_v44 = vpop.f32.mrb[5].mxu0 }
 0x4c3   :  { %1841 = vmatmul.mubr.msk.f32.vlgmr.msra.gmra.mrb[8].mxu0 %vm84_vm1, %v554_v37  ;;  %1874 = vmatmul.mubr.msk.f32.vlgmr.msra.gmra.mrb[12].mxu1 %vm84_vm1, %v554_v37 }
 0x4c4   :  { %1979 = vmatpush3.bf16.msra.mxu0 %v1978_v38  ;;  %1862 = vmatprep.mubr.msk.f32.mxu0 %vm2092_vm0, %v2093_v6 }
 0x4c5   :  { %1980 = vmatprep.subr.bf16.mxu0 %v2091_v3  ;;  %1997 = vmatpush3.bf16.msra.mxu1 %v1996_v43 }
 0x4c6   :  { %1998 = vmatprep.subr.bf16.mxu1 %v2091_v3  ;;  %1895 = vmatprep.mubr.msk.f32.mxu1 %vm2092_vm0, %v2093_v6 }
 0x4c8   :  { %1982 = vmatpush3.bf16.msra.mxu0 %v1981_v47 }
 0x4c9   :  { %1989 = vmatprep.subr.bf16.mxu0 %v2091_v3  ;;  %2000 = vmatpush3.bf16.msra.mxu1 %v1999_v50 }
 0x4ca   :  { %2007 = vmatprep.subr.bf16.mxu1 %v2091_v3 }
 0x4cb   :  { %1863 = vmatmul.mubr.msk.f32.vlgmr.msra.gmra.mrb[10].mxu0 %vm84_vm1, %v2379_v40 }
 0x4cc   :  { %1991 = vmatpush3.bf16.msra.mxu0 %v1990_v53  ;;  %1884 = vmatprep.mubr.msk.f32.mxu0 %vm2092_vm0, %v2093_v6 }
 0x4cd   :  { %1992 = vmatprep.subr.bf16.mxu0 %v2091_v3  ;;  %1896 = vmatmul.mubr.msk.f32.vlgmr.msra.gmra.mrb[14].mxu1 %vm84_vm1, %v2379_v40  ;;  %v1435_v40 = vld [vmem:[%s2624_s14 + $0x50] sm:$0xff]  ;;  %s2043_s14 = scalar_lea.vmem %s1619_s8, 32 }
 0x4ce   :  { %2009 = vmatpush3.bf16.msra.mxu1 %v2008_v56  ;;  %1917 = vmatprep.mubr.msk.f32.mxu1 %vm2092_vm0, %v2093_v6  ;;  %v2005_v1 = vpack.c.bf16 %v1436_v0, %v1435_v40  ;;  %p2044_p0 = scmp.ne.s32.totalorder %s1619_s8, %s2043_s14  ;;  %p2049_p2 = scmp.lt.s32.totalorder %s2043_s14, %s2043_s14 }
 0x4cf   :  { %2010 = vmatprep.subr.bf16.mxu1 %v2091_v3 }
 0x4d0   :  { %1994 = vmatpush3.bf16.msra.mxu0 %v1993_v59  ;;  %p2050_p3 = por %p2049_p2, %p2048_p1 }
 0x4d1   :  { %2001 = vmatprep.subr.bf16.mxu0 %v2091_v3 }
 0x4d2   :  { %2012 = vmatpush3.bf16.msra.mxu1 %v2011_v62  ;;  %p2051_p4 = pnand %p2050_p3, %p2044_p0 }
 0x4d3   :  { %1885 = vmatmul.mubr.msk.f32.vlgmr.msra.gmra.mrb[12].mxu0 %vm84_vm1, %v2452_v24 }
 0x4d4   :  { %2003 = vmatpush3.bf16.msra.mxu0 %v2002_v63  ;;  %1906 = vmatprep.mubr.msk.f32.mxu0 %vm2092_vm0, %v2093_v6 }
 0x4d5   :  { %2004 = vmatprep.subr.bf16.mxu0 %v2091_v3  ;;  %1918 = vmatmul.mubr.msk.f32.vlgmr.msra.gmra.mrb[16].mxu1 %vm84_vm1, %v2356_v33 }
 0x4d8   :  { %2006 = vmatpush3.bf16.msra.mxu0 %v2005_v1 }
 0x4db   :  { %1907 = vmatmul.mubr.msk.f32.vlgmr.msra.gmra.mrb[14].mxu0 %vm84_vm1, %v554_v37 }
 0x4dc   :  { %2054 = shalt.err (!%p2051_p4)
}
 0x4dd   :  { %s2055_s11 = scalar_lea.hbm %s2633_s23, 32 }
 0x4de   :  { %p2056_p5 = scmp.ne.s32.totalorder %s2633_s23, %s2055_s11  ;;  %p2059_p6 = scmp.lt.u32.totalorder %s2055_s11, %s2633_s23 }
 0x4e0   :  { %p2061_p7 = pnand %p2059_p6, %p2056_p5 }
 0x4e2   :  { %2064 = shalt.err (!%p2061_p7)
}
 0x4e3   :  { %1621 = dma.vmem_to_hbm [thread:$0]  %s1619_s8, 32, %s2633_s23, [#allocation9]   ;;  %v1644_v14 = vld [vmem:[%s2628_s18] ss:$0 sm:$0xff] }
 0x4e4   :  { %v1649_v23 = vld [vmem:[%s2629_s19] ss:$0 sm:$0xff]  ;;  %s2098_s6 = smov [#allocation6]  }
 0x4e5   :  { %v1655_v38 = vld [vmem:[%s2631_s21] ss:$0 sm:$0xff]  ;;  %s1608_s27 = sshll.u32 %s2098_s6, 4  ;;  %s1609_s27 = int_to_ptr.vmem [resolvable:$true] %s1608_s27 }
 0x4e6   :  { %v1654_v42 = vld [vmem:[%s2630_s20] ss:$0 sm:$0xff]  ;;  %s2065_s21 = scalar_lea.vmem %s1609_s27, 32  ;;  %p2070_p9 = scmp.lt.s32.totalorder %s1609_s27, %s1609_s27 }
 0x4e7   :  { %p2066_p8 = scmp.ne.s32.totalorder %s1609_s27, %s2065_s21  ;;  %p2071_p10 = scmp.lt.s32.totalorder %s2065_s21, %s2065_s21 }
 0x4e9   :  { %p2072_p11 = por %p2071_p10, %p2070_p9 }
 0x4eb   :  { %p2073_p12 = pnand %p2072_p11, %p2066_p8 }
 0x58e   :  { %v877_v3 = vpop.f32.mrb[6].mxu0  ;;  %v1121_v6 = vpop.f32.mrb[10].mxu1 }
 0x58f   :  { %v951_v2 = vadd.f32 %v2432_v13, %v877_v3  ;;  %v1820_v4 = vpop.f32.mrb[7].mxu0  ;;  %v1853_v5 = vpop.f32.mrb[11].mxu1 }
 0x596   :  { %v1027_v7 = vpop.f32.mrb[8].mxu0  ;;  %v1265_v8 = vpop.f32.mrb[12].mxu1 }
 0x597   :  { %v1031_v9 = vadd.f32 %v1027_v7, %v951_v2  ;;  %v1842_v10 = vpop.f32.mrb[9].mxu0  ;;  %v1875_v12 = vpop.f32.mrb[13].mxu1 }
 0x599   :  { %v1032_v15 = vadd.f32 %v1031_v9, %v2488_v39 }
 0x59b   :  { %v1040_v16 = vadd.f32 %v1644_v14, %v1032_v15 }
 0x59d   :  { %v1645_v17 = vmul.f32 -1.442695, %v1040_v16 }
 0x59e   :  { %v1191_v18 = vpop.f32.mrb[10].mxu0 }
 0x59f   :  { %2033 = vpow2.f32 %v1645_v17  ;;  %v1192_v19 = vadd.f32 %v1191_v18, %v1121_v6  ;;  %v1864_v20 = vpop.f32.mrb[11].mxu0 }
 0x5a0   :  { %v1429_v13 = vpop.f32.mrb[14].mxu1 }
 0x5a1   :  { %v1269_v21 = vadd.f32 %v1265_v8, %v1192_v19  ;;  %v1897_v22 = vpop.f32.mrb[15].mxu1 }
 0x5a3   :  { %v1270_v24 = vadd.f32 %v1269_v21, %v2430_v11 }
 0x5a5   :  { %v1278_v25 = vadd.f32 %v1649_v23, %v1270_v24 }
 0x5a6   :  { %v1359_v26 = vpop.f32.mrb[12].mxu0 }
 0x5a7   :  { %v1650_v27 = vmul.f32 -1.442695, %v1278_v25  ;;  %v1430_v28 = vadd.f32 %v1429_v13, %v1359_v26  ;;  %v1886_v29 = vpop.f32.mrb[13].mxu0 }
 0x5a8   :  { %v1589_v30 = vpop.f32.mrb[16].mxu1 }
 0x5a9   :  { %v2034_v31 = vpop.eup %2033  ;;  %2035 = vpow2.f32 %v1650_v27  ;;  %v1919_v32 = vpop.f32.mrb[17].mxu1  ;;  %v1590_v11 = vadd.f32 %v1655_v38, %v1589_v30 }
 0x5aa   :  { %v1044_v34 = vadd.f32 1.0, %v2034_v31 }
 0x5ac   :  { %2037 = vrcp.f32 %v1044_v34 }
 0x5ae   :  { %v1503_v35 = vpop.f32.mrb[14].mxu0 }
 0x5af   :  { %v1507_v36 = vadd.f32 %v1503_v35, %v1430_v28  ;;  %v1908_v37 = vpop.f32.mrb[15].mxu0 }
 0x5b1   :  { %v1515_v44 = vadd.f32 %v1654_v42, %v1507_v36 }
 0x5b3   :  { %v2036_v39 = vpop.eup %2035 }
 0x5b4   :  { %v1282_v41 = vadd.f32 1.0, %v2036_v39 }
 0x5b6   :  { %v2038_v43 = vpop.eup %2037  ;;  %2039 = vrcp.f32 %v1282_v41 }
 0x5b7   :  { %v1593_v45 = vmul.f32 %v2038_v43, %v1590_v11 }
 0x5b9   :  { %v1594_v46 = vadd.f32 %v1593_v45, %v1515_v44 }
 0x5bb   :  { %2041 = vtanh.f32 %v1594_v46 }
 0x5c0   :  { %v2040_v47 = vpop.eup %2039 }
 0x5c1   :  { %v1596_v48 = vsub.f32 1.0, %v2040_v47  ;;  %v1598_v51 = vmul.f32 %v2040_v47, %v2356_v33 }
 0x5c5   :  { %v2042_v49 = vpop.eup %2041 }
 0x5c6   :  { %v1597_v50 = vmul.f32 %v2042_v49, %v1596_v48 }
 0x5c8   :  { %v1599_v52 = vadd.f32 %v1598_v51, %v1597_v50 }
 0x5ca   :  { %1601 = vst.msk [vmem:[#allocation6] sm:$0x3] %vm158_vm2, %v1599_v52 }
 0x5cb   :  { %2076 = shalt.err (!%p2073_p12)
}
 0x5cc   :  { %s2077_s28 = scalar_lea.hbm %s2632_s22, 32 }
 0x5cd   :  { %p2078_p13 = scmp.ne.s32.totalorder %s2632_s22, %s2077_s28  ;;  %p2081_p0 = scmp.lt.u32.totalorder %s2077_s28, %s2632_s22 }
 0x5cf   :  { %p2083_p1 = pnand %p2081_p0, %p2078_p13 }
 0x5d1   :  { %2086 = shalt.err (!%p2083_p1)
}
 0x5d2   :  { %1611 = dma.vmem_to_hbm [thread:$0]  %s1609_s27, 32, %s2632_s22, [#allocation7]  }
 0x5d3   :  { %2087 = dma.done.wait [#allocation7], 32  }
 0x5d4   :  { %2088 = vsyncadd [#allocation7], 4294967264 }
 0x5d5   :  { %2089 = dma.done.wait [#allocation9], 32  }
 0x5d6   :  { %2090 = vsyncadd [#allocation9], 4294967264 }
 0x5d7   :  { %1628 = vsyncpa [#allocation7], 1 }
 0x5d8   :  { %1629 = vsyncpa [#allocation9], 1 }

</bundles_post_ra>
